<compile_context>
chip_gen: v7x
topology: tpu7x:2x2x1
jax: 0.10.0
libtpu: 0.0.40
codegen_flags: <defaults>
</compile_context>

<pallas_src>
import jax
import jax.numpy as jnp
from jax import lax
from jax.experimental import pallas as pl
from jax.experimental.pallas import tpu as pltpu

# ---- model hyper-parameters (tiny synthetic encoder) -----------------------
B, S, H = 2, 8, 32            # batch, seq len, hidden
NH, HD = 2, 16                # heads, head dim (NH * HD == H)
FF = 64                       # feed-forward width
L = 2                         # transformer layers
VOCAB, VOCAB_PAD = 100, 128   # vocab, padded to one lane tile for the 1-hot gather
EPS = 1e-12
SCALE = 1.0 / (HD ** 0.5)
BS = B * S

# ---- packed parameter layouts ----------------------------------------------
# bf16 weight slab: [L, W_ROWS, 128]
#   rows [0 : H)        cols [0:3H) : wq|wk|wv fused           ([H, 96])
#   rows [H : 2H)       cols [0:H)  : attention out proj wo    ([H, 32])
#   rows [2H: 3H)       cols [0:FF) : FFN w1                   ([H, 64])
#   rows [3H: 3H+FF)    cols [0:H)  : FFN w2                   ([FF, 32])
W_ROWS = 3 * H + FF                                   # 160

# f32 param slab: [P_ROWS, 128]
ROW_POS = 0              # rows [0:BS) cols [0:H): positional table (pre-tiled over batch)
ROW_EMB_G = BS           # embedding-LN gamma
ROW_EMB_B = BS + 1       # embedding-LN beta
ROW_L0 = BS + 2          # per-layer params start here, 8 rows per layer
QKV_B, O_B, LN1_G, LN1_B, FF1_B, FF2_B, LN2_G, LN2_B = range(8)
P_ROWS = ((ROW_L0 + 8 * L + 7) // 8) * 8              # 40


def _prow(p, r, n):
    """One parameter row (works identically on a Pallas Ref and a jnp array)."""
    return p[r:r + 1, 0:n]                            # [1, n]


def _layernorm(x, g, b):
    mu = jnp.mean(x, axis=-1, keepdims=True)
    var = jnp.mean((x - mu) ** 2, axis=-1, keepdims=True)
    return (x - mu) * lax.rsqrt(var + EPS) * g + b


def _encoder(x, w, p, ctx_put, ctx_get):
    """Shared encoder math (Pallas kernel and pure-JAX reference run this code).

    x : [BS, H] f32 embeddings (batch folded into rows).
    w : bf16 weight slab [L, W_ROWS, 128]   (Ref in kernel / array in reference).
    p : f32 param slab  [P_ROWS, 128].
    ctx_put(h, val) / ctx_get(): assemble the [BS, H] multi-head context
      (VMEM-scratch stores in the kernel, a concat in the reference).
    """
    x = _layernorm(x, _prow(p, ROW_EMB_G, H), _prow(p, ROW_EMB_B, H))

    for l in range(L):                                # static unroll
        base = ROW_L0 + 8 * l

        # ---- fused QKV projection: one bf16 GEMM, f32 accumulation ---------
        xb = x.astype(jnp.bfloat16)
        qkv = jnp.dot(xb, w[l, 0:H, 0:3 * H],
                      preferred_element_type=jnp.float32) + _prow(p, base + QKV_B, 3 * H)

        # ---- attention: batch-dim-batched einsums, loop only over heads ----
        for h in range(NH):                           # static unroll (NH = 2)
            lo = h * HD
            qh = qkv[:, lo:lo + HD].reshape(B, S, HD)               # f32, no re-round
            kh = qkv[:, H + lo:H + lo + HD].reshape(B, S, HD)
            vh = qkv[:, 2 * H + lo:2 * H + lo + HD].reshape(B, S, HD)
            s = jnp.einsum('bqd,bkd->bqk', qh, kh,
                           preferred_element_type=jnp.float32) * SCALE
            s = s - jnp.max(s, axis=-1, keepdims=True)
            e = jnp.exp(s)
            pr = e / jnp.sum(e, axis=-1, keepdims=True)             # exact reciprocal
            ch = jnp.einsum('bqk,bkd->bqd', pr, vh,
                            preferred_element_type=jnp.float32)
            ctx_put(h, ch.reshape(BS, HD))
        ctx = ctx_get()                               # [BS, H]

        # ---- output projection + residual + LN -----------------------------
        attn = jnp.dot(ctx.astype(jnp.bfloat16), w[l, H:2 * H, 0:H],
                       preferred_element_type=jnp.float32) + _prow(p, base + O_B, H)
        x = _layernorm(x + attn, _prow(p, base + LN1_G, H), _prow(p, base + LN1_B, H))

        # ---- feed forward ----------------------------------------------------
        h1 = jnp.dot(x.astype(jnp.bfloat16), w[l, 2 * H:3 * H, 0:FF],
                     preferred_element_type=jnp.float32) + _prow(p, base + FF1_B, FF)
        h1 = jax.nn.gelu(h1, approximate=True)        # tanh GELU -> EUP
        y = jnp.dot(h1.astype(jnp.bfloat16), w[l, 3 * H:3 * H + FF, 0:H],
                    preferred_element_type=jnp.float32) + _prow(p, base + FF2_B, H)
        x = _layernorm(x + y, _prow(p, base + LN2_G, H), _prow(p, base + LN2_B, H))

    return x                                          # [BS, H]


# ---------------------------------------------------------------------------
# Pallas kernel: single gridless invocation; 4 input refs (ids, embedding
# table, bf16 weight slab, f32 param slab), all resident in VMEM (<120 KiB).
# ---------------------------------------------------------------------------
def encoder_kernel(ids_ref, emb_ref, w_ref, p_ref, out_ref, ctx_ref):
    # -- embedding: exact one-hot gather on the MXU + positional add ---------
    ids = ids_ref[...]                                              # [BS, 1] int32
    vocab_iota = lax.broadcasted_iota(jnp.int32, (BS, VOCAB_PAD), 1)
    onehot = (ids == vocab_iota).astype(jnp.float32)                # [BS, VOCAB_PAD]
    x = jnp.dot(onehot, emb_ref[...], preferred_element_type=jnp.float32)
    x = x + p_ref[0:BS, 0:H]                                        # pre-tiled pos table

    def ctx_put(h, val):                                            # head ctx -> scratch
        ctx_ref[:, h * HD:(h + 1) * HD] = val

    def ctx_get():
        return ctx_ref[...]

    x = _encoder(x, w_ref, p_ref, ctx_put, ctx_get)                 # [BS, H]

    for b in range(B):                                              # CLS rows only
        out_ref[b:b + 1, :] = x[b * S:b * S + 1, :]


def encoder_pallas_cls(ids2d, word_emb, w_slab, p_slab):
    vmem = pl.BlockSpec(memory_space=pltpu.MemorySpace.VMEM)
    return pl.pallas_call(
        encoder_kernel,
        out_shape=jax.ShapeDtypeStruct((B, H), jnp.float32),
        in_specs=[vmem, vmem, vmem, vmem],
        out_specs=vmem,
        scratch_shapes=[pltpu.VMEM((BS, H), jnp.float32)],          # multi-head context
    )(ids2d, word_emb, w_slab, p_slab)


# ---------------------------------------------------------------------------
# SimCSE forward: token ids -> Pallas encoder -> CLS token (last_hidden[:, 0])
# ---------------------------------------------------------------------------
@jax.jit
def simcse_forward(params, input_ids):
    ids2d = input_ids.reshape(BS, 1).astype(jnp.int32)
    return encoder_pallas_cls(ids2d, params["word_emb"],
                              params["w_slab"], params["p_slab"])   # [B, H]


# ---------------------------------------------------------------------------
# Deterministic synthetic parameters, packed into the two slabs.
# ---------------------------------------------------------------------------
def init_params(key):
    ks = jax.random.split(key, 12)
    nrm = lambda k, shp: (0.02 * jax.random.normal(k, shp)).astype(jnp.float32)

    word_emb = jnp.zeros((VOCAB_PAD, H), jnp.float32).at[:VOCAB].set(nrm(ks[0], (VOCAB, H)))
    pos_emb = nrm(ks[1], (S, H))

    wq, wk, wv = nrm(ks[2], (L, H, H)), nrm(ks[3], (L, H, H)), nrm(ks[4], (L, H, H))
    wo = nrm(ks[5], (L, H, H))
    w1, w2 = nrm(ks[6], (L, H, FF)), nrm(ks[7], (L, FF, H))
    bqkv = nrm(ks[8], (L, 3 * H))
    bo = nrm(ks[9], (L, H))
    b1 = nrm(ks[10], (L, FF))
    b2 = nrm(ks[11], (L, H))

    # --- bf16 matmul-weight slab --------------------------------------------
    w_slab = jnp.zeros((L, W_ROWS, 128), jnp.bfloat16)
    wqkv = jnp.concatenate([wq, wk, wv], axis=-1)                   # [L, H, 3H]
    w_slab = w_slab.at[:, 0:H, 0:3 * H].set(wqkv.astype(jnp.bfloat16))
    w_slab = w_slab.at[:, H:2 * H, 0:H].set(wo.astype(jnp.bfloat16))
    w_slab = w_slab.at[:, 2 * H:3 * H, 0:FF].set(w1.astype(jnp.bfloat16))
    w_slab = w_slab.at[:, 3 * H:3 * H + FF, 0:H].set(w2.astype(jnp.bfloat16))

    # --- f32 bias / LN / positional slab ------------------------------------
    p_slab = jnp.zeros((P_ROWS, 128), jnp.float32)
    p_slab = p_slab.at[0:BS, 0:H].set(jnp.tile(pos_emb, (B, 1)))    # pre-tiled positions
    p_slab = p_slab.at[ROW_EMB_G, 0:H].set(1.0)                     # emb-LN gamma
    for l in range(L):
        base = ROW_L0 + 8 * l
        p_slab = p_slab.at[base + QKV_B, 0:3 * H].set(bqkv[l])
        p_slab = p_slab.at[base + O_B, 0:H].set(bo[l])
        p_slab = p_slab.at[base + LN1_G, 0:H].set(1.0)
        p_slab = p_slab.at[base + FF1_B, 0:FF].set(b1[l])
        p_slab = p_slab.at[base + FF2_B, 0:H].set(b2[l])
        p_slab = p_slab.at[base + LN2_G, 0:H].set(1.0)

    return dict(word_emb=word_emb, w_slab=w_slab, p_slab=p_slab)


# ---------------------------------------------------------------------------
# Pure-JAX reference: identical math (same bf16 weight slabs, f32 accum, exact
# softmax reciprocal); only the context assembly uses a concat instead of the
# VMEM scratch, which is value-identical.
# ---------------------------------------------------------------------------
def ref_forward(params, input_ids):
    ids = input_ids.reshape(BS)
    x = params["word_emb"][ids] + params["p_slab"][0:BS, 0:H]

    parts = {}
    def ctx_put(h, v): parts[h] = v
    def ctx_get(): return jnp.concatenate([parts[h] for h in range(NH)], axis=-1)

    hs = _encoder(x, params["w_slab"], params["p_slab"], ctx_put, ctx_get)
    return hs.reshape(B, S, H)[:, 0]                  # CLS pooling [B, H]


if __name__ == "__main__":
    key = jax.random.PRNGKey(0)
    pkey, ikey = jax.random.split(key)
    params = init_params(pkey)
    input_ids = jax.random.randint(ikey, (B, S), 0, VOCAB, dtype=jnp.int32)

    out = jax.block_until_ready(simcse_forward(params, input_ids))
    ref = jax.block_until_ready(ref_forward(params, input_ids))

    assert out.shape == (B, H), out.shape
    err = float(jnp.max(jnp.abs(out - ref)))
    # Same operand dtypes and exact softmax reciprocal in both paths; remaining
    # divergence is only matmul accumulation order / transcendental rounding.
    assert err < 1e-3, err
    print("KERNEL_OK")
</pallas_src>

<mosaic_0001>
module attributes {stable_mosaic.version = 11 : i64} {
  func.func @encoder_kernel(%arg0: memref<16x1xi32, #tpu.memory_space<vmem>>, %arg1: memref<128x32xf32, #tpu.memory_space<vmem>>, %arg2: memref<2x160x128xbf16, #tpu.memory_space<vmem>>, %arg3: memref<40x128xf32, #tpu.memory_space<vmem>>, %arg4: memref<2x32xf32, #tpu.memory_space<vmem>>, %arg5: memref<16x32xf32, #tpu.memory_space<vmem>>) attributes {dimension_semantics = [], scalar_prefetch = 0 : i64, scratch_operands = 1 : i64, tpu.core_type = #tpu.core_type<tc>} {
    %c0 = arith.constant 0 : index
    %c0_0 = arith.constant 0 : index
    %0 = vector.load %arg0[%c0, %c0_0] : memref<16x1xi32, #tpu.memory_space<vmem>>, vector<16x1xi32>
    %1 = tpu.iota {dimensions = array<i32: 1>} : vector<16x128xi32>
    %2 = vector.broadcast %0 : vector<16x1xi32> to vector<16x128xi32>
    %3 = arith.cmpi eq, %2, %1 : vector<16x128xi32>
    %4 = arith.extui %3 : vector<16x128xi1> to vector<16x128xi32>
    %5 = arith.sitofp %4 : vector<16x128xi32> to vector<16x128xf32>
    %c0_1 = arith.constant 0 : index
    %c0_2 = arith.constant 0 : index
    %6 = vector.load %arg1[%c0_1, %c0_2] : memref<128x32xf32, #tpu.memory_space<vmem>>, vector<128x32xf32>
    %cst = arith.constant dense<0.000000e+00> : vector<16x32xf32>
    %7 = tpu.matmul %5, %6, %cst {dimension_numbers = #tpu.dot_dimension_numbers<[1], [0], [0], [1], [0, 0, 1, 1], [], []>} : vector<16x128xf32>, vector<128x32xf32>, vector<16x32xf32> -> vector<16x32xf32>
    %c0_3 = arith.constant 0 : index
    %c0_4 = arith.constant 0 : index
    %8 = vector.load %arg3[%c0_3, %c0_4] : memref<40x128xf32, #tpu.memory_space<vmem>>, vector<16x32xf32>
    %9 = arith.addf %7, %8 : vector<16x32xf32>
    %c16 = arith.constant 16 : index
    %c0_5 = arith.constant 0 : index
    %10 = vector.load %arg3[%c16, %c0_5] : memref<40x128xf32, #tpu.memory_space<vmem>>, vector<1x32xf32>
    %c17 = arith.constant 17 : index
    %c0_6 = arith.constant 0 : index
    %11 = vector.load %arg3[%c17, %c0_6] : memref<40x128xf32, #tpu.memory_space<vmem>>, vector<1x32xf32>
    %cst_7 = arith.constant dense<0.000000e+00> : vector<16xf32>
    %12 = vector.multi_reduction <add>, %9, %cst_7 [1] : vector<16x32xf32> to vector<16xf32>
    %13 = vector.shape_cast %12 : vector<16xf32> to vector<16x1xf32>
    %cst_8 = arith.constant 3.200000e+01 : f32
    %14 = vector.broadcast %cst_8 : f32 to vector<16x1xf32>
    %15 = arith.divf %13, %14 : vector<16x1xf32>
    %16 = vector.broadcast %15 : vector<16x1xf32> to vector<16x32xf32>
    %17 = arith.subf %9, %16 : vector<16x32xf32>
    %18 = arith.mulf %17, %17 : vector<16x32xf32>
    %cst_9 = arith.constant dense<0.000000e+00> : vector<16xf32>
    %19 = vector.multi_reduction <add>, %18, %cst_9 [1] : vector<16x32xf32> to vector<16xf32>
    %20 = vector.shape_cast %19 : vector<16xf32> to vector<16x1xf32>
    %cst_10 = arith.constant 3.200000e+01 : f32
    %21 = vector.broadcast %cst_10 : f32 to vector<16x1xf32>
    %22 = arith.divf %20, %21 : vector<16x1xf32>
    %23 = vector.broadcast %15 : vector<16x1xf32> to vector<16x32xf32>
    %24 = arith.subf %9, %23 : vector<16x32xf32>
    %cst_11 = arith.constant 9.99999996E-13 : f32
    %25 = vector.broadcast %cst_11 : f32 to vector<16x1xf32>
    %26 = arith.addf %22, %25 : vector<16x1xf32>
    %27 = math.rsqrt %26 : vector<16x1xf32>
    %28 = vector.broadcast %27 : vector<16x1xf32> to vector<16x32xf32>
    %29 = arith.mulf %24, %28 : vector<16x32xf32>
    %30 = vector.broadcast %10 : vector<1x32xf32> to vector<16x32xf32>
    %31 = arith.mulf %29, %30 : vector<16x32xf32>
    %32 = vector.broadcast %11 : vector<1x32xf32> to vector<16x32xf32>
    %33 = arith.addf %31, %32 : vector<16x32xf32>
    %34 = arith.truncf %33 : vector<16x32xf32> to vector<16x32xbf16>
    %c0_12 = arith.constant 0 : index
    %c0_13 = arith.constant 0 : index
    %c0_14 = arith.constant 0 : index
    %35 = vector.load %arg2[%c0_12, %c0_13, %c0_14] : memref<2x160x128xbf16, #tpu.memory_space<vmem>>, vector<1x32x96xbf16>
    %36 = vector.shape_cast %35 : vector<1x32x96xbf16> to vector<32x96xbf16>
    %cst_15 = arith.constant dense<0.000000e+00> : vector<16x96xf32>
    %37 = tpu.matmul %34, %36, %cst_15 {dimension_numbers = #tpu.dot_dimension_numbers<[1], [0], [0], [1], [0, 0, 1, 1], [], []>} : vector<16x32xbf16>, vector<32x96xbf16>, vector<16x96xf32> -> vector<16x96xf32>
    %c18 = arith.constant 18 : index
    %c0_16 = arith.constant 0 : index
    %38 = vector.load %arg3[%c18, %c0_16] : memref<40x128xf32, #tpu.memory_space<vmem>>, vector<1x96xf32>
    %39 = vector.broadcast %38 : vector<1x96xf32> to vector<16x96xf32>
    %40 = arith.addf %37, %39 : vector<16x96xf32>
    %41 = vector.extract_strided_slice %40 {offsets = [0, 0], sizes = [16, 16], strides = [1, 1]} : vector<16x96xf32> to vector<16x16xf32>
    %42 = vector.shape_cast %41 : vector<16x16xf32> to vector<2x8x16xf32>
    %43 = vector.extract_strided_slice %40 {offsets = [0, 32], sizes = [16, 16], strides = [1, 1]} : vector<16x96xf32> to vector<16x16xf32>
    %44 = vector.shape_cast %43 : vector<16x16xf32> to vector<2x8x16xf32>
    %45 = vector.extract_strided_slice %40 {offsets = [0, 64], sizes = [16, 16], strides = [1, 1]} : vector<16x96xf32> to vector<16x16xf32>
    %46 = vector.shape_cast %45 : vector<16x16xf32> to vector<2x8x16xf32>
    "tpu.trace_start"() <{level = 10 : i32, message = "bqd,bkd->bqk"}> : () -> ()
    %cst_17 = arith.constant dense<0.000000e+00> : vector<2x8x8xf32>
    %47 = tpu.matmul %42, %44, %cst_17 {dimension_numbers = #tpu.dot_dimension_numbers<[2], [2], [1], [1], [0, 0, 0, 1, 1, 1], [0], [0]>} : vector<2x8x16xf32>, vector<2x8x16xf32>, vector<2x8x8xf32> -> vector<2x8x8xf32>
    "tpu.trace_stop"() : () -> ()
    %cst_18 = arith.constant 2.500000e-01 : f32
    %48 = vector.broadcast %cst_18 : f32 to vector<2x8x8xf32>
    %49 = arith.mulf %47, %48 : vector<2x8x8xf32>
    %cst_19 = arith.constant dense<0xFF800000> : vector<2x8xf32>
    %50 = vector.multi_reduction <maximumf>, %49, %cst_19 [2] : vector<2x8x8xf32> to vector<2x8xf32>
    %51 = vector.shape_cast %50 : vector<2x8xf32> to vector<2x8x1xf32>
    %52 = vector.broadcast %51 : vector<2x8x1xf32> to vector<2x8x8xf32>
    %53 = arith.subf %49, %52 : vector<2x8x8xf32>
    %54 = math.exp %53 : vector<2x8x8xf32>
    %cst_20 = arith.constant dense<0.000000e+00> : vector<2x8xf32>
    %55 = vector.multi_reduction <add>, %54, %cst_20 [2] : vector<2x8x8xf32> to vector<2x8xf32>
    %56 = vector.shape_cast %55 : vector<2x8xf32> to vector<2x8x1xf32>
    %57 = vector.broadcast %56 : vector<2x8x1xf32> to vector<2x8x8xf32>
    %58 = arith.divf %54, %57 : vector<2x8x8xf32>
    "tpu.trace_start"() <{level = 10 : i32, message = "bqk,bkd->bqd"}> : () -> ()
    %cst_21 = arith.constant dense<0.000000e+00> : vector<2x8x16xf32>
    %59 = tpu.matmul %58, %46, %cst_21 {dimension_numbers = #tpu.dot_dimension_numbers<[2], [1], [1], [2], [0, 0, 0, 1, 1, 2], [0], [0]>} : vector<2x8x8xf32>, vector<2x8x16xf32>, vector<2x8x16xf32> -> vector<2x8x16xf32>
    "tpu.trace_stop"() : () -> ()
    %60 = vector.shape_cast %59 : vector<2x8x16xf32> to vector<16x16xf32>
    %c0_22 = arith.constant 0 : index
    %c0_23 = arith.constant 0 : index
    %61 = vector.load %arg5[%c0_22, %c0_23] : memref<16x32xf32, #tpu.memory_space<vmem>>, vector<16x16xf32>
    tpu.vector_store %arg5[%c0_22, %c0_23], %60 {strides = array<i32>} : memref<16x32xf32, #tpu.memory_space<vmem>>, vector<16x16xf32>,
    %62 = vector.extract_strided_slice %40 {offsets = [0, 16], sizes = [16, 16], strides = [1, 1]} : vector<16x96xf32> to vector<16x16xf32>
    %63 = vector.shape_cast %62 : vector<16x16xf32> to vector<2x8x16xf32>
    %64 = vector.extract_strided_slice %40 {offsets = [0, 48], sizes = [16, 16], strides = [1, 1]} : vector<16x96xf32> to vector<16x16xf32>
    %65 = vector.shape_cast %64 : vector<16x16xf32> to vector<2x8x16xf32>
    %66 = vector.extract_strided_slice %40 {offsets = [0, 80], sizes = [16, 16], strides = [1, 1]} : vector<16x96xf32> to vector<16x16xf32>
    %67 = vector.shape_cast %66 : vector<16x16xf32> to vector<2x8x16xf32>
    "tpu.trace_start"() <{level = 10 : i32, message = "bqd,bkd->bqk"}> : () -> ()
    %cst_24 = arith.constant dense<0.000000e+00> : vector<2x8x8xf32>
    %68 = tpu.matmul %63, %65, %cst_24 {dimension_numbers = #tpu.dot_dimension_numbers<[2], [2], [1], [1], [0, 0, 0, 1, 1, 1], [0], [0]>} : vector<2x8x16xf32>, vector<2x8x16xf32>, vector<2x8x8xf32> -> vector<2x8x8xf32>
    "tpu.trace_stop"() : () -> ()
    %cst_25 = arith.constant 2.500000e-01 : f32
    %69 = vector.broadcast %cst_25 : f32 to vector<2x8x8xf32>
    %70 = arith.mulf %68, %69 : vector<2x8x8xf32>
    %cst_26 = arith.constant dense<0xFF800000> : vector<2x8xf32>
    %71 = vector.multi_reduction <maximumf>, %70, %cst_26 [2] : vector<2x8x8xf32> to vector<2x8xf32>
    %72 = vector.shape_cast %71 : vector<2x8xf32> to vector<2x8x1xf32>
    %73 = vector.broadcast %72 : vector<2x8x1xf32> to vector<2x8x8xf32>
    %74 = arith.subf %70, %73 : vector<2x8x8xf32>
    %75 = math.exp %74 : vector<2x8x8xf32>
    %cst_27 = arith.constant dense<0.000000e+00> : vector<2x8xf32>
    %76 = vector.multi_reduction <add>, %75, %cst_27 [2] : vector<2x8x8xf32> to vector<2x8xf32>
    %77 = vector.shape_cast %76 : vector<2x8xf32> to vector<2x8x1xf32>
    %78 = vector.broadcast %77 : vector<2x8x1xf32> to vector<2x8x8xf32>
    %79 = arith.divf %75, %78 : vector<2x8x8xf32>
    "tpu.trace_start"() <{level = 10 : i32, message = "bqk,bkd->bqd"}> : () -> ()
    %cst_28 = arith.constant dense<0.000000e+00> : vector<2x8x16xf32>
    %80 = tpu.matmul %79, %67, %cst_28 {dimension_numbers = #tpu.dot_dimension_numbers<[2], [1], [1], [2], [0, 0, 0, 1, 1, 2], [0], [0]>} : vector<2x8x8xf32>, vector<2x8x16xf32>, vector<2x8x16xf32> -> vector<2x8x16xf32>
    "tpu.trace_stop"() : () -> ()
    %81 = vector.shape_cast %80 : vector<2x8x16xf32> to vector<16x16xf32>
    %c0_29 = arith.constant 0 : index
    %c16_30 = arith.constant 16 : index
    %82 = vector.load %arg5[%c0_29, %c16_30] : memref<16x32xf32, #tpu.memory_space<vmem>>, vector<16x16xf32>
    tpu.vector_store %arg5[%c0_29, %c16_30], %81 {strides = array<i32>} : memref<16x32xf32, #tpu.memory_space<vmem>>, vector<16x16xf32>,
    %c0_31 = arith.constant 0 : index
    %c0_32 = arith.constant 0 : index
    %83 = vector.load %arg5[%c0_31, %c0_32] : memref<16x32xf32, #tpu.memory_space<vmem>>, vector<16x32xf32>
    %84 = arith.truncf %83 : vector<16x32xf32> to vector<16x32xbf16>
    %c0_33 = arith.constant 0 : index
    %c32 = arith.constant 32 : index
    %c0_34 = arith.constant 0 : index
    %85 = vector.load %arg2[%c0_33, %c32, %c0_34] : memref<2x160x128xbf16, #tpu.memory_space<vmem>>, vector<1x32x32xbf16>
    %86 = vector.shape_cast %85 : vector<1x32x32xbf16> to vector<32x32xbf16>
    %cst_35 = arith.constant dense<0.000000e+00> : vector<16x32xf32>
    %87 = tpu.matmul %84, %86, %cst_35 {dimension_numbers = #tpu.dot_dimension_numbers<[1], [0], [0], [1], [0, 0, 1, 1], [], []>} : vector<16x32xbf16>, vector<32x32xbf16>, vector<16x32xf32> -> vector<16x32xf32>
    %c19 = arith.constant 19 : index
    %c0_36 = arith.constant 0 : index
    %88 = vector.load %arg3[%c19, %c0_36] : memref<40x128xf32, #tpu.memory_space<vmem>>, vector<1x32xf32>
    %89 = vector.broadcast %88 : vector<1x32xf32> to vector<16x32xf32>
    %90 = arith.addf %87, %89 : vector<16x32xf32>
    %91 = arith.addf %33, %90 : vector<16x32xf32>
    %c20 = arith.constant 20 : index
    %c0_37 = arith.constant 0 : index
    %92 = vector.load %arg3[%c20, %c0_37] : memref<40x128xf32, #tpu.memory_space<vmem>>, vector<1x32xf32>
    %c21 = arith.constant 21 : index
    %c0_38 = arith.constant 0 : index
    %93 = vector.load %arg3[%c21, %c0_38] : memref<40x128xf32, #tpu.memory_space<vmem>>, vector<1x32xf32>
    %cst_39 = arith.constant dense<0.000000e+00> : vector<16xf32>
    %94 = vector.multi_reduction <add>, %91, %cst_39 [1] : vector<16x32xf32> to vector<16xf32>
    %95 = vector.shape_cast %94 : vector<16xf32> to vector<16x1xf32>
    %cst_40 = arith.constant 3.200000e+01 : f32
    %96 = vector.broadcast %cst_40 : f32 to vector<16x1xf32>
    %97 = arith.divf %95, %96 : vector<16x1xf32>
    %98 = vector.broadcast %97 : vector<16x1xf32> to vector<16x32xf32>
    %99 = arith.subf %91, %98 : vector<16x32xf32>
    %100 = arith.mulf %99, %99 : vector<16x32xf32>
    %cst_41 = arith.constant dense<0.000000e+00> : vector<16xf32>
    %101 = vector.multi_reduction <add>, %100, %cst_41 [1] : vector<16x32xf32> to vector<16xf32>
    %102 = vector.shape_cast %101 : vector<16xf32> to vector<16x1xf32>
    %cst_42 = arith.constant 3.200000e+01 : f32
    %103 = vector.broadcast %cst_42 : f32 to vector<16x1xf32>
    %104 = arith.divf %102, %103 : vector<16x1xf32>
    %105 = vector.broadcast %97 : vector<16x1xf32> to vector<16x32xf32>
    %106 = arith.subf %91, %105 : vector<16x32xf32>
    %cst_43 = arith.constant 9.99999996E-13 : f32
    %107 = vector.broadcast %cst_43 : f32 to vector<16x1xf32>
    %108 = arith.addf %104, %107 : vector<16x1xf32>
    %109 = math.rsqrt %108 : vector<16x1xf32>
    %110 = vector.broadcast %109 : vector<16x1xf32> to vector<16x32xf32>
    %111 = arith.mulf %106, %110 : vector<16x32xf32>
    %112 = vector.broadcast %92 : vector<1x32xf32> to vector<16x32xf32>
    %113 = arith.mulf %111, %112 : vector<16x32xf32>
    %114 = vector.broadcast %93 : vector<1x32xf32> to vector<16x32xf32>
    %115 = arith.addf %113, %114 : vector<16x32xf32>
    %116 = arith.truncf %115 : vector<16x32xf32> to vector<16x32xbf16>
    %c0_44 = arith.constant 0 : index
    %c64 = arith.constant 64 : index
    %c0_45 = arith.constant 0 : index
    %117 = vector.load %arg2[%c0_44, %c64, %c0_45] : memref<2x160x128xbf16, #tpu.memory_space<vmem>>, vector<1x32x64xbf16>
    %118 = vector.shape_cast %117 : vector<1x32x64xbf16> to vector<32x64xbf16>
    %cst_46 = arith.constant dense<0.000000e+00> : vector<16x64xf32>
    %119 = tpu.matmul %116, %118, %cst_46 {dimension_numbers = #tpu.dot_dimension_numbers<[1], [0], [0], [1], [0, 0, 1, 1], [], []>} : vector<16x32xbf16>, vector<32x64xbf16>, vector<16x64xf32> -> vector<16x64xf32>
    %c22 = arith.constant 22 : index
    %c0_47 = arith.constant 0 : index
    %120 = vector.load %arg3[%c22, %c0_47] : memref<40x128xf32, #tpu.memory_space<vmem>>, vector<1x64xf32>
    %121 = vector.broadcast %120 : vector<1x64xf32> to vector<16x64xf32>
    %122 = arith.addf %119, %121 : vector<16x64xf32>
    %123 = arith.mulf %122, %122 : vector<16x64xf32>
    %124 = arith.mulf %122, %123 : vector<16x64xf32>
    %cst_48 = arith.constant 4.471500e-02 : f32
    %125 = vector.broadcast %cst_48 : f32 to vector<16x64xf32>
    %126 = arith.mulf %125, %124 : vector<16x64xf32>
    %127 = arith.addf %122, %126 : vector<16x64xf32>
    %cst_49 = arith.constant 0.797884583 : f32
    %128 = vector.broadcast %cst_49 : f32 to vector<16x64xf32>
    %129 = arith.mulf %128, %127 : vector<16x64xf32>
    %130 = math.tanh %129 : vector<16x64xf32>
    %cst_50 = arith.constant 1.000000e+00 : f32
    %131 = vector.broadcast %cst_50 : f32 to vector<16x64xf32>
    %132 = arith.addf %131, %130 : vector<16x64xf32>
    %cst_51 = arith.constant 5.000000e-01 : f32
    %133 = vector.broadcast %cst_51 : f32 to vector<16x64xf32>
    %134 = arith.mulf %133, %132 : vector<16x64xf32>
    %135 = arith.mulf %122, %134 : vector<16x64xf32>
    %136 = arith.truncf %135 : vector<16x64xf32> to vector<16x64xbf16>
    %c0_52 = arith.constant 0 : index
    %c96 = arith.constant 96 : index
    %c0_53 = arith.constant 0 : index
    %137 = vector.load %arg2[%c0_52, %c96, %c0_53] : memref<2x160x128xbf16, #tpu.memory_space<vmem>>, vector<1x64x32xbf16>
    %138 = vector.shape_cast %137 : vector<1x64x32xbf16> to vector<64x32xbf16>
    %cst_54 = arith.constant dense<0.000000e+00> : vector<16x32xf32>
    %139 = tpu.matmul %136, %138, %cst_54 {dimension_numbers = #tpu.dot_dimension_numbers<[1], [0], [0], [1], [0, 0, 1, 1], [], []>} : vector<16x64xbf16>, vector<64x32xbf16>, vector<16x32xf32> -> vector<16x32xf32>
    %c23 = arith.constant 23 : index
    %c0_55 = arith.constant 0 : index
    %140 = vector.load %arg3[%c23, %c0_55] : memref<40x128xf32, #tpu.memory_space<vmem>>, vector<1x32xf32>
    %141 = vector.broadcast %140 : vector<1x32xf32> to vector<16x32xf32>
    %142 = arith.addf %139, %141 : vector<16x32xf32>
    %143 = arith.addf %115, %142 : vector<16x32xf32>
    %c24 = arith.constant 24 : index
    %c0_56 = arith.constant 0 : index
    %144 = vector.load %arg3[%c24, %c0_56] : memref<40x128xf32, #tpu.memory_space<vmem>>, vector<1x32xf32>
    %c25 = arith.constant 25 : index
    %c0_57 = arith.constant 0 : index
    %145 = vector.load %arg3[%c25, %c0_57] : memref<40x128xf32, #tpu.memory_space<vmem>>, vector<1x32xf32>
    %cst_58 = arith.constant dense<0.000000e+00> : vector<16xf32>
    %146 = vector.multi_reduction <add>, %143, %cst_58 [1] : vector<16x32xf32> to vector<16xf32>
    %147 = vector.shape_cast %146 : vector<16xf32> to vector<16x1xf32>
    %cst_59 = arith.constant 3.200000e+01 : f32
    %148 = vector.broadcast %cst_59 : f32 to vector<16x1xf32>
    %149 = arith.divf %147, %148 : vector<16x1xf32>
    %150 = vector.broadcast %149 : vector<16x1xf32> to vector<16x32xf32>
    %151 = arith.subf %143, %150 : vector<16x32xf32>
    %152 = arith.mulf %151, %151 : vector<16x32xf32>
    %cst_60 = arith.constant dense<0.000000e+00> : vector<16xf32>
    %153 = vector.multi_reduction <add>, %152, %cst_60 [1] : vector<16x32xf32> to vector<16xf32>
    %154 = vector.shape_cast %153 : vector<16xf32> to vector<16x1xf32>
    %cst_61 = arith.constant 3.200000e+01 : f32
    %155 = vector.broadcast %cst_61 : f32 to vector<16x1xf32>
    %156 = arith.divf %154, %155 : vector<16x1xf32>
    %157 = vector.broadcast %149 : vector<16x1xf32> to vector<16x32xf32>
    %158 = arith.subf %143, %157 : vector<16x32xf32>
    %cst_62 = arith.constant 9.99999996E-13 : f32
    %159 = vector.broadcast %cst_62 : f32 to vector<16x1xf32>
    %160 = arith.addf %156, %159 : vector<16x1xf32>
    %161 = math.rsqrt %160 : vector<16x1xf32>
    %162 = vector.broadcast %161 : vector<16x1xf32> to vector<16x32xf32>
    %163 = arith.mulf %158, %162 : vector<16x32xf32>
    %164 = vector.broadcast %144 : vector<1x32xf32> to vector<16x32xf32>
    %165 = arith.mulf %163, %164 : vector<16x32xf32>
    %166 = vector.broadcast %145 : vector<1x32xf32> to vector<16x32xf32>
    %167 = arith.addf %165, %166 : vector<16x32xf32>
    %168 = arith.truncf %167 : vector<16x32xf32> to vector<16x32xbf16>
    %c1 = arith.constant 1 : index
    %c0_63 = arith.constant 0 : index
    %c0_64 = arith.constant 0 : index
    %169 = vector.load %arg2[%c1, %c0_63, %c0_64] : memref<2x160x128xbf16, #tpu.memory_space<vmem>>, vector<1x32x96xbf16>
    %170 = vector.shape_cast %169 : vector<1x32x96xbf16> to vector<32x96xbf16>
    %cst_65 = arith.constant dense<0.000000e+00> : vector<16x96xf32>
    %171 = tpu.matmul %168, %170, %cst_65 {dimension_numbers = #tpu.dot_dimension_numbers<[1], [0], [0], [1], [0, 0, 1, 1], [], []>} : vector<16x32xbf16>, vector<32x96xbf16>, vector<16x96xf32> -> vector<16x96xf32>
    %c26 = arith.constant 26 : index
    %c0_66 = arith.constant 0 : index
    %172 = vector.load %arg3[%c26, %c0_66] : memref<40x128xf32, #tpu.memory_space<vmem>>, vector<1x96xf32>
    %173 = vector.broadcast %172 : vector<1x96xf32> to vector<16x96xf32>
    %174 = arith.addf %171, %173 : vector<16x96xf32>
    %175 = vector.extract_strided_slice %174 {offsets = [0, 0], sizes = [16, 16], strides = [1, 1]} : vector<16x96xf32> to vector<16x16xf32>
    %176 = vector.shape_cast %175 : vector<16x16xf32> to vector<2x8x16xf32>
    %177 = vector.extract_strided_slice %174 {offsets = [0, 32], sizes = [16, 16], strides = [1, 1]} : vector<16x96xf32> to vector<16x16xf32>
    %178 = vector.shape_cast %177 : vector<16x16xf32> to vector<2x8x16xf32>
    %179 = vector.extract_strided_slice %174 {offsets = [0, 64], sizes = [16, 16], strides = [1, 1]} : vector<16x96xf32> to vector<16x16xf32>
    %180 = vector.shape_cast %179 : vector<16x16xf32> to vector<2x8x16xf32>
    "tpu.trace_start"() <{level = 10 : i32, message = "bqd,bkd->bqk"}> : () -> ()
    %cst_67 = arith.constant dense<0.000000e+00> : vector<2x8x8xf32>
    %181 = tpu.matmul %176, %178, %cst_67 {dimension_numbers = #tpu.dot_dimension_numbers<[2], [2], [1], [1], [0, 0, 0, 1, 1, 1], [0], [0]>} : vector<2x8x16xf32>, vector<2x8x16xf32>, vector<2x8x8xf32> -> vector<2x8x8xf32>
    "tpu.trace_stop"() : () -> ()
    %cst_68 = arith.constant 2.500000e-01 : f32
    %182 = vector.broadcast %cst_68 : f32 to vector<2x8x8xf32>
    %183 = arith.mulf %181, %182 : vector<2x8x8xf32>
    %cst_69 = arith.constant dense<0xFF800000> : vector<2x8xf32>
    %184 = vector.multi_reduction <maximumf>, %183, %cst_69 [2] : vector<2x8x8xf32> to vector<2x8xf32>
    %185 = vector.shape_cast %184 : vector<2x8xf32> to vector<2x8x1xf32>
    %186 = vector.broadcast %185 : vector<2x8x1xf32> to vector<2x8x8xf32>
    %187 = arith.subf %183, %186 : vector<2x8x8xf32>
    %188 = math.exp %187 : vector<2x8x8xf32>
    %cst_70 = arith.constant dense<0.000000e+00> : vector<2x8xf32>
    %189 = vector.multi_reduction <add>, %188, %cst_70 [2] : vector<2x8x8xf32> to vector<2x8xf32>
    %190 = vector.shape_cast %189 : vector<2x8xf32> to vector<2x8x1xf32>
    %191 = vector.broadcast %190 : vector<2x8x1xf32> to vector<2x8x8xf32>
    %192 = arith.divf %188, %191 : vector<2x8x8xf32>
    "tpu.trace_start"() <{level = 10 : i32, message = "bqk,bkd->bqd"}> : () -> ()
    %cst_71 = arith.constant dense<0.000000e+00> : vector<2x8x16xf32>
    %193 = tpu.matmul %192, %180, %cst_71 {dimension_numbers = #tpu.dot_dimension_numbers<[2], [1], [1], [2], [0, 0, 0, 1, 1, 2], [0], [0]>} : vector<2x8x8xf32>, vector<2x8x16xf32>, vector<2x8x16xf32> -> vector<2x8x16xf32>
    "tpu.trace_stop"() : () -> ()
    %194 = vector.shape_cast %193 : vector<2x8x16xf32> to vector<16x16xf32>
    %c0_72 = arith.constant 0 : index
    %c0_73 = arith.constant 0 : index
    %195 = vector.load %arg5[%c0_72, %c0_73] : memref<16x32xf32, #tpu.memory_space<vmem>>, vector<16x16xf32>
    tpu.vector_store %arg5[%c0_72, %c0_73], %194 {strides = array<i32>} : memref<16x32xf32, #tpu.memory_space<vmem>>, vector<16x16xf32>,
    %196 = vector.extract_strided_slice %174 {offsets = [0, 16], sizes = [16, 16], strides = [1, 1]} : vector<16x96xf32> to vector<16x16xf32>
    %197 = vector.shape_cast %196 : vector<16x16xf32> to vector<2x8x16xf32>
    %198 = vector.extract_strided_slice %174 {offsets = [0, 48], sizes = [16, 16], strides = [1, 1]} : vector<16x96xf32> to vector<16x16xf32>
    %199 = vector.shape_cast %198 : vector<16x16xf32> to vector<2x8x16xf32>
    %200 = vector.extract_strided_slice %174 {offsets = [0, 80], sizes = [16, 16], strides = [1, 1]} : vector<16x96xf32> to vector<16x16xf32>
    %201 = vector.shape_cast %200 : vector<16x16xf32> to vector<2x8x16xf32>
    "tpu.trace_start"() <{level = 10 : i32, message = "bqd,bkd->bqk"}> : () -> ()
    %cst_74 = arith.constant dense<0.000000e+00> : vector<2x8x8xf32>
    %202 = tpu.matmul %197, %199, %cst_74 {dimension_numbers = #tpu.dot_dimension_numbers<[2], [2], [1], [1], [0, 0, 0, 1, 1, 1], [0], [0]>} : vector<2x8x16xf32>, vector<2x8x16xf32>, vector<2x8x8xf32> -> vector<2x8x8xf32>
    "tpu.trace_stop"() : () -> ()
    %cst_75 = arith.constant 2.500000e-01 : f32
    %203 = vector.broadcast %cst_75 : f32 to vector<2x8x8xf32>
    %204 = arith.mulf %202, %203 : vector<2x8x8xf32>
    %cst_76 = arith.constant dense<0xFF800000> : vector<2x8xf32>
    %205 = vector.multi_reduction <maximumf>, %204, %cst_76 [2] : vector<2x8x8xf32> to vector<2x8xf32>
    %206 = vector.shape_cast %205 : vector<2x8xf32> to vector<2x8x1xf32>
    %207 = vector.broadcast %206 : vector<2x8x1xf32> to vector<2x8x8xf32>
    %208 = arith.subf %204, %207 : vector<2x8x8xf32>
    %209 = math.exp %208 : vector<2x8x8xf32>
    %cst_77 = arith.constant dense<0.000000e+00> : vector<2x8xf32>
    %210 = vector.multi_reduction <add>, %209, %cst_77 [2] : vector<2x8x8xf32> to vector<2x8xf32>
    %211 = vector.shape_cast %210 : vector<2x8xf32> to vector<2x8x1xf32>
    %212 = vector.broadcast %211 : vector<2x8x1xf32> to vector<2x8x8xf32>
    %213 = arith.divf %209, %212 : vector<2x8x8xf32>
    "tpu.trace_start"() <{level = 10 : i32, message = "bqk,bkd->bqd"}> : () -> ()
    %cst_78 = arith.constant dense<0.000000e+00> : vector<2x8x16xf32>
    %214 = tpu.matmul %213, %201, %cst_78 {dimension_numbers = #tpu.dot_dimension_numbers<[2], [1], [1], [2], [0, 0, 0, 1, 1, 2], [0], [0]>} : vector<2x8x8xf32>, vector<2x8x16xf32>, vector<2x8x16xf32> -> vector<2x8x16xf32>
    "tpu.trace_stop"() : () -> ()
    %215 = vector.shape_cast %214 : vector<2x8x16xf32> to vector<16x16xf32>
    %c0_79 = arith.constant 0 : index
    %c16_80 = arith.constant 16 : index
    %216 = vector.load %arg5[%c0_79, %c16_80] : memref<16x32xf32, #tpu.memory_space<vmem>>, vector<16x16xf32>
    tpu.vector_store %arg5[%c0_79, %c16_80], %215 {strides = array<i32>} : memref<16x32xf32, #tpu.memory_space<vmem>>, vector<16x16xf32>,
    %c0_81 = arith.constant 0 : index
    %c0_82 = arith.constant 0 : index
    %217 = vector.load %arg5[%c0_81, %c0_82] : memref<16x32xf32, #tpu.memory_space<vmem>>, vector<16x32xf32>
    %218 = arith.truncf %217 : vector<16x32xf32> to vector<16x32xbf16>
    %c1_83 = arith.constant 1 : index
    %c32_84 = arith.constant 32 : index
    %c0_85 = arith.constant 0 : index
    %219 = vector.load %arg2[%c1_83, %c32_84, %c0_85] : memref<2x160x128xbf16, #tpu.memory_space<vmem>>, vector<1x32x32xbf16>
    %220 = vector.shape_cast %219 : vector<1x32x32xbf16> to vector<32x32xbf16>
    %cst_86 = arith.constant dense<0.000000e+00> : vector<16x32xf32>
    %221 = tpu.matmul %218, %220, %cst_86 {dimension_numbers = #tpu.dot_dimension_numbers<[1], [0], [0], [1], [0, 0, 1, 1], [], []>} : vector<16x32xbf16>, vector<32x32xbf16>, vector<16x32xf32> -> vector<16x32xf32>
    %c27 = arith.constant 27 : index
    %c0_87 = arith.constant 0 : index
    %222 = vector.load %arg3[%c27, %c0_87] : memref<40x128xf32, #tpu.memory_space<vmem>>, vector<1x32xf32>
    %223 = vector.broadcast %222 : vector<1x32xf32> to vector<16x32xf32>
    %224 = arith.addf %221, %223 : vector<16x32xf32>
    %225 = arith.addf %167, %224 : vector<16x32xf32>
    %c28 = arith.constant 28 : index
    %c0_88 = arith.constant 0 : index
    %226 = vector.load %arg3[%c28, %c0_88] : memref<40x128xf32, #tpu.memory_space<vmem>>, vector<1x32xf32>
    %c29 = arith.constant 29 : index
    %c0_89 = arith.constant 0 : index
    %227 = vector.load %arg3[%c29, %c0_89] : memref<40x128xf32, #tpu.memory_space<vmem>>, vector<1x32xf32>
    %cst_90 = arith.constant dense<0.000000e+00> : vector<16xf32>
    %228 = vector.multi_reduction <add>, %225, %cst_90 [1] : vector<16x32xf32> to vector<16xf32>
    %229 = vector.shape_cast %228 : vector<16xf32> to vector<16x1xf32>
    %cst_91 = arith.constant 3.200000e+01 : f32
    %230 = vector.broadcast %cst_91 : f32 to vector<16x1xf32>
    %231 = arith.divf %229, %230 : vector<16x1xf32>
    %232 = vector.broadcast %231 : vector<16x1xf32> to vector<16x32xf32>
    %233 = arith.subf %225, %232 : vector<16x32xf32>
    %234 = arith.mulf %233, %233 : vector<16x32xf32>
    %cst_92 = arith.constant dense<0.000000e+00> : vector<16xf32>
    %235 = vector.multi_reduction <add>, %234, %cst_92 [1] : vector<16x32xf32> to vector<16xf32>
    %236 = vector.shape_cast %235 : vector<16xf32> to vector<16x1xf32>
    %cst_93 = arith.constant 3.200000e+01 : f32
    %237 = vector.broadcast %cst_93 : f32 to vector<16x1xf32>
    %238 = arith.divf %236, %237 : vector<16x1xf32>
    %239 = vector.broadcast %231 : vector<16x1xf32> to vector<16x32xf32>
    %240 = arith.subf %225, %239 : vector<16x32xf32>
    %cst_94 = arith.constant 9.99999996E-13 : f32
    %241 = vector.broadcast %cst_94 : f32 to vector<16x1xf32>
    %242 = arith.addf %238, %241 : vector<16x1xf32>
    %243 = math.rsqrt %242 : vector<16x1xf32>
    %244 = vector.broadcast %243 : vector<16x1xf32> to vector<16x32xf32>
    %245 = arith.mulf %240, %244 : vector<16x32xf32>
    %246 = vector.broadcast %226 : vector<1x32xf32> to vector<16x32xf32>
    %247 = arith.mulf %245, %246 : vector<16x32xf32>
    %248 = vector.broadcast %227 : vector<1x32xf32> to vector<16x32xf32>
    %249 = arith.addf %247, %248 : vector<16x32xf32>
    %250 = arith.truncf %249 : vector<16x32xf32> to vector<16x32xbf16>
    %c1_95 = arith.constant 1 : index
    %c64_96 = arith.constant 64 : index
    %c0_97 = arith.constant 0 : index
    %251 = vector.load %arg2[%c1_95, %c64_96, %c0_97] : memref<2x160x128xbf16, #tpu.memory_space<vmem>>, vector<1x32x64xbf16>
    %252 = vector.shape_cast %251 : vector<1x32x64xbf16> to vector<32x64xbf16>
    %cst_98 = arith.constant dense<0.000000e+00> : vector<16x64xf32>
    %253 = tpu.matmul %250, %252, %cst_98 {dimension_numbers = #tpu.dot_dimension_numbers<[1], [0], [0], [1], [0, 0, 1, 1], [], []>} : vector<16x32xbf16>, vector<32x64xbf16>, vector<16x64xf32> -> vector<16x64xf32>
    %c30 = arith.constant 30 : index
    %c0_99 = arith.constant 0 : index
    %254 = vector.load %arg3[%c30, %c0_99] : memref<40x128xf32, #tpu.memory_space<vmem>>, vector<1x64xf32>
    %255 = vector.broadcast %254 : vector<1x64xf32> to vector<16x64xf32>
    %256 = arith.addf %253, %255 : vector<16x64xf32>
    %257 = arith.mulf %256, %256 : vector<16x64xf32>
    %258 = arith.mulf %256, %257 : vector<16x64xf32>
    %cst_100 = arith.constant 4.471500e-02 : f32
    %259 = vector.broadcast %cst_100 : f32 to vector<16x64xf32>
    %260 = arith.mulf %259, %258 : vector<16x64xf32>
    %261 = arith.addf %256, %260 : vector<16x64xf32>
    %cst_101 = arith.constant 0.797884583 : f32
    %262 = vector.broadcast %cst_101 : f32 to vector<16x64xf32>
    %263 = arith.mulf %262, %261 : vector<16x64xf32>
    %264 = math.tanh %263 : vector<16x64xf32>
    %cst_102 = arith.constant 1.000000e+00 : f32
    %265 = vector.broadcast %cst_102 : f32 to vector<16x64xf32>
    %266 = arith.addf %265, %264 : vector<16x64xf32>
    %cst_103 = arith.constant 5.000000e-01 : f32
    %267 = vector.broadcast %cst_103 : f32 to vector<16x64xf32>
    %268 = arith.mulf %267, %266 : vector<16x64xf32>
    %269 = arith.mulf %256, %268 : vector<16x64xf32>
    %270 = arith.truncf %269 : vector<16x64xf32> to vector<16x64xbf16>
    %c1_104 = arith.constant 1 : index
    %c96_105 = arith.constant 96 : index
    %c0_106 = arith.constant 0 : index
    %271 = vector.load %arg2[%c1_104, %c96_105, %c0_106] : memref<2x160x128xbf16, #tpu.memory_space<vmem>>, vector<1x64x32xbf16>
    %272 = vector.shape_cast %271 : vector<1x64x32xbf16> to vector<64x32xbf16>
    %cst_107 = arith.constant dense<0.000000e+00> : vector<16x32xf32>
    %273 = tpu.matmul %270, %272, %cst_107 {dimension_numbers = #tpu.dot_dimension_numbers<[1], [0], [0], [1], [0, 0, 1, 1], [], []>} : vector<16x64xbf16>, vector<64x32xbf16>, vector<16x32xf32> -> vector<16x32xf32>
    %c31 = arith.constant 31 : index
    %c0_108 = arith.constant 0 : index
    %274 = vector.load %arg3[%c31, %c0_108] : memref<40x128xf32, #tpu.memory_space<vmem>>, vector<1x32xf32>
    %275 = vector.broadcast %274 : vector<1x32xf32> to vector<16x32xf32>
    %276 = arith.addf %273, %275 : vector<16x32xf32>
    %277 = arith.addf %249, %276 : vector<16x32xf32>
    %c32_109 = arith.constant 32 : index
    %c0_110 = arith.constant 0 : index
    %278 = vector.load %arg3[%c32_109, %c0_110] : memref<40x128xf32, #tpu.memory_space<vmem>>, vector<1x32xf32>
    %c33 = arith.constant 33 : index
    %c0_111 = arith.constant 0 : index
    %279 = vector.load %arg3[%c33, %c0_111] : memref<40x128xf32, #tpu.memory_space<vmem>>, vector<1x32xf32>
    %cst_112 = arith.constant dense<0.000000e+00> : vector<16xf32>
    %280 = vector.multi_reduction <add>, %277, %cst_112 [1] : vector<16x32xf32> to vector<16xf32>
    %281 = vector.shape_cast %280 : vector<16xf32> to vector<16x1xf32>
    %cst_113 = arith.constant 3.200000e+01 : f32
    %282 = vector.broadcast %cst_113 : f32 to vector<16x1xf32>
    %283 = arith.divf %281, %282 : vector<16x1xf32>
    %284 = vector.broadcast %283 : vector<16x1xf32> to vector<16x32xf32>
    %285 = arith.subf %277, %284 : vector<16x32xf32>
    %286 = arith.mulf %285, %285 : vector<16x32xf32>
    %cst_114 = arith.constant dense<0.000000e+00> : vector<16xf32>
    %287 = vector.multi_reduction <add>, %286, %cst_114 [1] : vector<16x32xf32> to vector<16xf32>
    %288 = vector.shape_cast %287 : vector<16xf32> to vector<16x1xf32>
    %cst_115 = arith.constant 3.200000e+01 : f32
    %289 = vector.broadcast %cst_115 : f32 to vector<16x1xf32>
    %290 = arith.divf %288, %289 : vector<16x1xf32>
    %291 = vector.broadcast %283 : vector<16x1xf32> to vector<16x32xf32>
    %292 = arith.subf %277, %291 : vector<16x32xf32>
    %cst_116 = arith.constant 9.99999996E-13 : f32
    %293 = vector.broadcast %cst_116 : f32 to vector<16x1xf32>
    %294 = arith.addf %290, %293 : vector<16x1xf32>
    %295 = math.rsqrt %294 : vector<16x1xf32>
    %296 = vector.broadcast %295 : vector<16x1xf32> to vector<16x32xf32>
    %297 = arith.mulf %292, %296 : vector<16x32xf32>
    %298 = vector.broadcast %278 : vector<1x32xf32> to vector<16x32xf32>
    %299 = arith.mulf %297, %298 : vector<16x32xf32>
    %300 = vector.broadcast %279 : vector<1x32xf32> to vector<16x32xf32>
    %301 = arith.addf %299, %300 : vector<16x32xf32>
    %302 = vector.extract_strided_slice %301 {offsets = [0, 0], sizes = [1, 32], strides = [1, 1]} : vector<16x32xf32> to vector<1x32xf32>
    %c0_117 = arith.constant 0 : index
    %c0_118 = arith.constant 0 : index
    %303 = vector.load %arg4[%c0_117, %c0_118] : memref<2x32xf32, #tpu.memory_space<vmem>>, vector<1x32xf32>
    tpu.vector_store %arg4[%c0_117, %c0_118], %302 {strides = array<i32>} : memref<2x32xf32, #tpu.memory_space<vmem>>, vector<1x32xf32>,
    %304 = vector.extract_strided_slice %301 {offsets = [8, 0], sizes = [1, 32], strides = [1, 1]} : vector<16x32xf32> to vector<1x32xf32>
    %c1_119 = arith.constant 1 : index
    %c0_120 = arith.constant 0 : index
    %305 = vector.load %arg4[%c1_119, %c0_120] : memref<2x32xf32, #tpu.memory_space<vmem>>, vector<1x32xf32>
    tpu.vector_store %arg4[%c1_119, %c0_120], %304 {strides = array<i32>} : memref<2x32xf32, #tpu.memory_space<vmem>>, vector<1x32xf32>,
    return
  }
}

</mosaic_0001>

<bundles_post_ra>
// kernel: simcse_forward.1
= control target key start
LH: loop header
LB: loop body
LE: loop exit
PB: predicated region body
PF: predicated region fallthrough
CT: control target
= control target key end

     0   :  { %9 = vsyncpa [#allocation4], 0  ;;  %s3266_s0 = inlined_call_operand.vmem [shape: s32[16,1], index: 0, kind: input, shape index: {}]   ;;  %s3267_s1 = inlined_call_operand.vmem [shape: f32[128,32], index: 1, kind: input, shape index: {}]   ;;  %s3268_s2 = inlined_call_operand.vmem [shape: bf16[2,160,128], index: 2, kind: input, shape index: {}]   ;;  %s3269_s3 = inlined_call_operand.hbm [shape: f32[40,128], index: 3, kind: input, shape index: {}]   ;;  %s3270_s4 = inlined_call_operand.hbm [shape: f32[2,32], index: 4, kind: output, shape index: {}]  }
   0x1   :  { %10 = vsyncpa [#allocation5], 0  ;;  %s2857_s15 = smov [#allocation3]   ;;  %s2809_s19 = scalar_lea.hbm %s3269_s3, 640 }
   0x2   :  { %s22_s16 = sshll.u32 %s2857_s15, 4  ;;  %p2810_p0 = scmp.ne.s32.totalorder %s3269_s3, %s2809_s19  ;;  %s23_s16 = int_to_ptr.vmem [resolvable:$true] %s22_s16 }
   0x3   :  { %p2813_p1 = scmp.lt.u32.totalorder %s2809_s19, %s3269_s3 }
   0x5   :  { %p2815_p2 = pnand %p2813_p1, %p2810_p0 }
   0x7   :  { %2818 = shalt.err (!%p2815_p2)
}
   0x8   :  { %s2819_s24 = scalar_lea.vmem %s23_s16, 640  ;;  %p2824_p4 = scmp.lt.s32.totalorder %s23_s16, %s23_s16 }
   0x9   :  { %p2820_p3 = scmp.ne.s32.totalorder %s23_s16, %s2819_s24  ;;  %p2825_p5 = scmp.lt.s32.totalorder %s2819_s24, %s2819_s24 }
   0xb   :  { %p2826_p6 = por %p2825_p5, %p2824_p4 }
   0xd   :  { %p2827_p7 = pnand %p2826_p6, %p2820_p3 }
   0xf   :  { %2830 = shalt.err (!%p2827_p7)
}
  0x10   :  { %s2858_s25 = smov 128   ;;  %s2859_s26 = smov 8  }
  0x11   :  { %28 = dma.hbm_to_vmem [thread:$0]  %s3269_s3, 640, %s23_s16, [#allocation4], %s2858_s25, %s2858_s25, %s2859_s26  }
  0x12   :  { %2853 = dma.done.wait [#allocation4], 640  }
  0x13   :  { %2854 = vsyncadd [#allocation4], 4294966656  ;;  %v2860_v0 = vmov 0   ;;  %v33_v1 = vld [vmem:[%s3266_s0] sm:$0xff]  ;;  %v50_v3 = vld [vmem:[%s3267_s1 + $0x8] sm:$0xff]  ;;  %v35_v27 = vlaneseq  ;;  %v2861_v30 = vmov 1.0  }
  0x14   :  { %2728 = vset.pattern.permute.xlu0 %v2860_v0  ;;  %v49_v2 = vld [vmem:[%s3267_s1] sm:$0xff]  ;;  %v51_v4 = vld [vmem:[%s3267_s1 + $0x10] sm:$0xff]  ;;  %v52_v5 = vld [vmem:[%s3267_s1 + $0x18] sm:$0xff]  ;;  %vm144_vm2 = vcmask 261120   ;;  %v2862_v51 = vmov 0.0   ;;  %vm2863_vm3 = vmmov 0  }
  0x15   :  { %38 = vperm.xlu0 %2728, %v33_v1   ;;  %v34_v6 = vld [vmem:[%s3266_s0 + $0x8] sm:$0xff]  ;;  %v2682_v7 = vpack.c.bf16 %v50_v3, %v49_v2  ;;  %v2686_v8 = vpack.c.bf16 %v52_v5, %v51_v4  ;;  %v53_v9 = vld [vmem:[%s3267_s1 + $0x20] sm:$0xff]  ;;  %v55_v11 = vld [vmem:[%s3267_s1 + $0x30] sm:$0xff]  ;;  %v36_v28 = vand.u32 127, %v35_v27  ;;  %2530 = vmatprep.subr.bf16.mxu1 %v2862_v51  ;;  %s2864_s13 = smov 64   ;;  %s2865_s14 = smov 96  }
  0x16   :  { %v54_v10 = vld [vmem:[%s3267_s1 + $0x28] sm:$0xff]  ;;  %v56_v13 = vld [vmem:[%s3267_s1 + $0x38] sm:$0xff]  ;;  %v57_v14 = vld [vmem:[%s3267_s1 + $0x40] sm:$0xff]  ;;  %2534 = vmatprep.mubr.msk.bf16.mxu1 %vm2863_vm3, %v2862_v51  ;;  %s2866_s15 = smov 80   ;;  %vm253_vm4 = vcmask 130048   ;;  %vm407_vm5 = vcmask 64512  }
  0x17   :  { %2683 = vmatprep.subr.bf16.mxu0 %v2682_v7  ;;  %v2690_v12 = vpack.c.bf16 %v54_v10, %v53_v9  ;;  %v58_v15 = vld [vmem:[%s3267_s1 + $0x48] sm:$0xff]  ;;  %v2694_v16 = vpack.c.bf16 %v56_v13, %v55_v11  ;;  %v59_v17 = vld [vmem:[%s3267_s1 + $0x50] sm:$0xff]  ;;  %v60_v18 = vld [vmem:[%s3267_s1 + $0x58] sm:$0xff]  ;;  %s2867_s16 = smov 112   ;;  %s2868_s17 = smov 48   ;;  %vm924_vm6 = vcmask 261248  }
  0x18   :  { %2685 = vmatpush3.bf16.msra.mxu0 %v2682_v7  ;;  %v2698_v19 = vpack.c.bf16 %v58_v15, %v57_v14  ;;  %v61_v20 = vld [vmem:[%s3267_s1 + $0x60] sm:$0xff]  ;;  %v2702_v21 = vpack.c.bf16 %v60_v18, %v59_v17  ;;  %v62_v22 = vld [vmem:[%s3267_s1 + $0x68] sm:$0xff]  ;;  %v63_v24 = vld [vmem:[%s3267_s1 + $0x70] sm:$0xff]  ;;  %s2869_s18 = smov 16   ;;  %vm1159_vm7 = vcmask 523264   ;;  %vm2305_vm8 = vcmask 253952  }
  0x19   :  { %41 = vperm.xlu0 %2728, %v34_v6   ;;  %2687 = vmatprep.subr.bf16.mxu0 %v2686_v8  ;;  %v2706_v23 = vpack.c.bf16 %v62_v22, %v61_v20  ;;  %v64_v25 = vld [vmem:[%s3267_s1 + $0x78] sm:$0xff]  ;;  %v65_v32 = vld [vmem:[#allocation3] sm:$0xff]  ;;  %v2729_v50 = vld [vmem:[%s3268_s2] sm:$0xff]  }
  0x1a   :  { %v2710_v26 = vpack.c.bf16 %v64_v25, %v63_v24  ;;  %v66_v34 = vld [vmem:[#allocation3 + $0x8] sm:$0xff]  ;;  %2531 = vmatpush3.bf16.msra.mxu1 %v2729_v50  ;;  %v2730_v52 = vld [vmem:[%s3268_s2 + $0x8] sm:$0xff]   ;;  %v2327_v61 = vld [vmem:[#allocation3 + $0x10] ss:$0 sm:$0xff] }
  0x1b   :  { %2532 = vmatprep.subr.bf16.mxu1 %v2862_v51  ;;  %v2328_v1 = vld [vmem:[#allocation3 + $0x11] ss:$0 sm:$0xff]  ;;  %v2329_v6 = vld [vmem:[#allocation3 + $0x12] ss:$0 sm:$0xff] }
  0x1c   :  { %2689 = vmatpush3.bf16.msra.mxu0 %v2686_v8 }
  0x1d   :  { %2691 = vmatprep.subr.bf16.mxu0 %v2690_v12 }
  0x1e   :  { %2533 = vmatpush3.bf16.msra.mxu1 %v2730_v52 }
  0x1f   :  { %2543 = vmatprep.subr.mxu1 %v2862_v51 }
  0x20   :  { %2693 = vmatpush3.bf16.msra.mxu0 %v2690_v12 }
  0x21   :  { %2695 = vmatprep.subr.bf16.mxu0 %v2694_v16 }
  0x24   :  { %2697 = vmatpush3.bf16.msra.mxu0 %v2694_v16 }
  0x25   :  { %2699 = vmatprep.subr.bf16.mxu0 %v2698_v19 }
  0x28   :  { %2701 = vmatpush3.bf16.msra.mxu0 %v2698_v19 }
  0x29   :  { %2703 = vmatprep.subr.bf16.mxu0 %v2702_v21 }
  0x2c   :  { %2705 = vmatpush3.bf16.msra.mxu0 %v2702_v21 }
  0x2d   :  { %2707 = vmatprep.subr.bf16.mxu0 %v2706_v23 }
  0x30   :  { %2709 = vmatpush3.bf16.msra.mxu0 %v2706_v23 }
  0x31   :  { %2711 = vmatprep.subr.bf16.mxu0 %v2710_v26 }
  0x34   :  { %2713 = vmatpush3.bf16.msra.mxu0 %v2710_v26 }
  0x35   :  { %2538 = vmatprep.subr.mxu0 %v2862_v51 }
  0x94   :  { %v39_v29 = vpop.permute.xlu0 %38 }
  0x95   :  { %vm43_vm0 = vcmp.eq.s32.totalorder %v39_v29, %v36_v28 }
  0x96   :  { %2527 = vmatprep.mubr.msk.f32.mxu0 %vm43_vm0, %v2861_v30 }
  0x98   :  { %v42_v31 = vpop.permute.xlu0 %41 }
  0x99   :  { %vm44_vm1 = vcmp.eq.s32.totalorder %v42_v31, %v36_v28 }
  0x9a   :  { %2528 = vmatmul.mubr.msk.f32.vlgmr.msra.gmra.mrb[0].mxu0 %vm44_vm1, %v2861_v30 }
  0x9b   :  { %2540 = vmatprep.mubr.msk.f32.mxu0 %vm2863_vm3, %v2862_v51 }
 0x16d   :  { %v2529_v33 = vpop.f32.mrb[0].mxu0 }
 0x16e   :  { %v133_v35 = vpop.f32.mrb[1].mxu0  ;;  %v139_v37 = vadd.f32 %v2529_v33, %v66_v34 }
 0x16f   :  { %v134_v36 = vadd.f32 %v133_v35, %v65_v32 }
 0x170   :  { %v148_v39 = vsel %vm144_vm2, %v139_v37, 0.0 }
 0x171   :  { %v145_v38 = vsel %vm144_vm2, %v134_v36, 0.0 }
 0x172   :  { %146 = vadd.xlane.f32.xlu1 %v145_v38 }
 0x176   :  { %149 = vadd.xlane.f32.xlu1 %v148_v39 }
 0x1ff   :  { %v147_v40 = vpop.xlane.xlu1 %146 }
 0x200   :  { %v152_v41 = vmul.f32 0.03125, %v147_v40 }
 0x202   :  { %v154_v42 = vsub.f32 %v134_v36, %v152_v41 }
 0x203   :  { %v150_v43 = vpop.xlane.xlu1 %149 }
 0x204   :  { %v153_v44 = vmul.f32 0.03125, %v150_v43  ;;  %v156_v45 = vmul.f32 %v154_v42, %v154_v42 }
 0x206   :  { %v155_v46 = vsub.f32 %v139_v37, %v153_v44  ;;  %v158_v47 = vsel %vm144_vm2, %v156_v45, 0.0 }
 0x207   :  { %159 = vadd.xlane.f32.xlu0 %v158_v47 }
 0x208   :  { %v157_v48 = vmul.f32 %v155_v46, %v155_v46 }
 0x20a   :  { %v161_v49 = vsel %vm144_vm2, %v157_v48, 0.0 }
 0x20b   :  { %162 = vadd.xlane.f32.xlu1 %v161_v49 }
 0x294   :  { %v160_v53 = vpop.xlane.xlu0 %159 }
 0x295   :  { %v164_v54 = vmul.f32 0.03125, %v160_v53 }
 0x297   :  { %v166_v55 = vadd.f32 1e-12, %v164_v54 }
 0x298   :  { %v163_v56 = vpop.xlane.xlu1 %162 }
 0x299   :  { %2749 = vrsqrt.f32 %v166_v55  ;;  %v165_v57 = vmul.f32 0.03125, %v163_v56 }
 0x29b   :  { %v167_v58 = vadd.f32 1e-12, %v165_v57 }
 0x29d   :  { %2751 = vrsqrt.f32 %v167_v58 }
 0x2a3   :  { %v2750_v59 = vpop.eup %2749 }
 0x2a4   :  { %v170_v60 = vmul.f32 %v2750_v59, %v154_v42 }
 0x2a6   :  { %v176_v0 = vmul.f32 %v2327_v61, %v170_v60 }
 0x2a7   :  { %v2752_v62 = vpop.eup %2751 }
 0x2a8   :  { %v171_v63 = vmul.f32 %v2752_v62, %v155_v46  ;;  %v2980_v3 = vadd.f32 %v2328_v1, %v176_v0 }
 0x2aa   :  { %v177_v2 = vmul.f32 %v2327_v61, %v171_v63 }
 0x2ac   :  { %v2982_v4 = vadd.f32 %v2328_v1, %v177_v2 }
 0x2ae   :  { %v184_v5 = vpack.c.bf16 %v2982_v4, %v2980_v3 }
 0x2b0   :  { %2535 = vmatmul.mubr.msk.bf16.vlgmr.msra.gmra.mrb[0].mxu1 %vm144_vm2, %v184_v5 }
 0x2b1   :  { %2545 = vmatprep.mubr.msk.f32.mxu1 %vm2863_vm3, %v2862_v51 }
 0x383   :  { %v243_v7 = vpop.f32.mrb[0].mxu1 }
 0x384   :  { %v2989_v8 = vadd.f32 %v2329_v6, %v243_v7  ;;  %v2536_v9 = vpop.f32.mrb[1].mxu1 }
 0x385   :  { %v246_v10 = vpop.f32.mrb[2].mxu1 }
 0x386   :  { %430 = vrot.lane.b32.xlu0 %v2989_v8, %s2864_s13  ;;  %251 = vrot.lane.b32.xlu1 %v2989_v8, %s2865_s14  ;;  %v2537_v11 = vpop.f32.mrb[3].mxu1  ;;  %v2995_v12 = vadd.f32 %v2329_v6, %v246_v10 }
 0x38a   :  { %586 = vrot.lane.b32.xlu0 %v2989_v8, %s2866_s15  ;;  %329 = vrot.lane.b32.xlu1 %v2995_v12, %s2865_s14 }
 0x3f8   :  { %v252_v13 = vpop.permute.xlu1 %251  ;;  %v431_v15 = vpop.permute.xlu0 %430 }
 0x3f9   :  { %2539 = vmatpush3.xpose.msk.msra.mxu0 %vm253_vm4, %v252_v13 }
 0x3fa   :  { %2563 = vmatprep.subr.mxu0 %v2862_v51 }
 0x3fc   :  { %2541 = vmatmul.mubr.msk.f32.vlgmr.msra.gmra.mrb[2].mxu0 %vm253_vm4, %v2989_v8  ;;  %v330_v14 = vpop.permute.xlu1 %329  ;;  %v587_v24 = vpop.permute.xlu0 %586 }
 0x3fd   :  { %2544 = vmatpush3.xpose.msk.msra.mxu1 %vm253_vm4, %v330_v14  ;;  %2565 = vmatprep.mubr.msk.f32.mxu0 %vm2863_vm3, %v2862_v51 }
 0x3fe   :  { %2548 = vmatprep.subr.mxu1 %v2862_v51 }
 0x400   :  { %2546 = vmatmul.mubr.msk.f32.vlgmr.msra.gmra.mrb[4].mxu1 %vm253_vm4, %v2995_v12 }
 0x401   :  { %2549 = vmatpush3.msra.mxu1 %v431_v15  ;;  %2550 = vmatprep.mubr.msk.f32.mxu1 %vm2863_vm3, %v2862_v51 }
 0x402   :  { %2553 = vmatprep.subr.mxu1 %v2862_v51 }
 0x4cf   :  { %v324_v16 = vpop.f32.mrb[2].mxu0 }
 0x4d0   :  { %v405_v17 = vmul.f32 0.25, %v324_v16  ;;  %v2542_v18 = vpop.f32.mrb[3].mxu0  ;;  %v2731_v16 = vld [vmem:[%s3268_s2 + $0x10] sm:$0xff]  }
 0x4d2   :  { %v408_v19 = vsel %vm407_vm5, %v405_v17, -inf }
 0x4d3   :  { %409 = vmax.xlane.f32.xlu1 %v408_v19  ;;  %v401_v20 = vpop.f32.mrb[4].mxu1 }
 0x4d4   :  { %v406_v21 = vmul.f32 0.25, %v401_v20  ;;  %v2547_v22 = vpop.f32.mrb[5].mxu1 }
 0x4d6   :  { %v411_v23 = vsel %vm407_vm5, %v406_v21, -inf }
 0x4d7   :  { %412 = vmax.xlane.f32.xlu0 %v411_v23 }
 0x4e4   :  { %506 = vrot.lane.b32.xlu1 %v2995_v12, %s2864_s13 }
 0x4ed   :  { %664 = vrot.lane.b32.xlu0 %v2995_v12, %s2866_s15 }
 0x560   :  { %v410_v25 = vpop.xlane.xlu1 %409 }
 0x561   :  { %v414_v26 = vsub.f32 %v405_v17, %v410_v25  ;;  %v2732_v17 = vld [vmem:[%s3268_s2 + $0x18] sm:$0xff]   ;;  %v2345_v25 = vld [vmem:[#allocation3 + $0x13] ss:$0 sm:$0xff] }
 0x563   :  { %v416_v27 = vmul.f32 1.442695, %v414_v26 }
 0x564   :  { %v413_v28 = vpop.xlane.xlu0 %412  ;;  %v507_v39 = vpop.permute.xlu1 %506 }
 0x565   :  { %2753 = vpow2.f32 %v416_v27  ;;  %v415_v32 = vsub.f32 %v406_v21, %v413_v28 }
 0x567   :  { %v418_v33 = vmul.f32 1.442695, %v415_v32 }
 0x568   :  { %v665_v29 = vpop.permute.xlu0 %664 }
 0x569   :  { %2564 = vmatpush3.xpose.msk.msra.mxu0 %vm253_vm4, %v665_v29  ;;  %2755 = vpow2.f32 %v418_v33 }
 0x56a   :  { %2573 = vmatprep.subr.mxu0 %v2862_v51 }
 0x56f   :  { %v2754_v30 = vpop.eup %2753 }
 0x570   :  { %v420_v31 = vsel %vm407_vm5, %v2754_v30, 0.0 }
 0x571   :  { %421 = vadd.xlane.f32.xlu0 %v420_v31 }
 0x573   :  { %v2756_v34 = vpop.eup %2755 }
 0x574   :  { %v423_v35 = vsel %vm407_vm5, %v2756_v34, 0.0 }
 0x587   :  { %584 = vrot.lane.b32.xlu0 %v2989_v8, %s2867_s16 }
 0x5a6   :  { %424 = vadd.xlane.f32.xlu0 %v423_v35 }
 0x5bc   :  { %662 = vrot.lane.b32.xlu0 %v2995_v12, %s2867_s16 }
 0x5fe   :  { %v422_v36 = vpop.xlane.xlu0 %421 }
 0x5ff   :  { %2757 = vrcp.f32 %v422_v36 }
 0x602   :  { %v585_v40 = vpop.permute.xlu0 %584 }
 0x609   :  { %v2758_v37 = vpop.eup %2757 }
 0x60a   :  { %v427_v38 = vmul.f32 %v2758_v37, %v2754_v30 }
 0x60c   :  { %2551 = vmatmul.mubr.msk.f32.vlgmr.msra.gmra.mrb[6].mxu1 %vm407_vm5, %v427_v38 }
 0x60d   :  { %2554 = vmatpush3.msra.mxu1 %v507_v39  ;;  %2555 = vmatprep.mubr.msk.f32.mxu1 %vm2863_vm3, %v2862_v51 }
 0x60e   :  { %2558 = vmatprep.subr.mxu1 %v2862_v51 }
 0x633   :  { %v425_v41 = vpop.xlane.xlu0 %424 }
 0x634   :  { %2759 = vrcp.f32 %v425_v41 }
 0x637   :  { %v663_v42 = vpop.permute.xlu0 %662 }
 0x638   :  { %2566 = vmatmul.mubr.msk.f32.vlgmr.msra.gmra.mrb[4].mxu0 %vm253_vm4, %v663_v42 }
 0x639   :  { %2575 = vmatprep.mubr.msk.f32.mxu0 %vm2863_vm3, %v2862_v51 }
 0x63e   :  { %v2760_v43 = vpop.eup %2759 }
 0x63f   :  { %v429_v44 = vmul.f32 %v2760_v43, %v2756_v34 }
 0x641   :  { %2556 = vmatmul.mubr.msk.f32.vlgmr.msra.gmra.mrb[8].mxu1 %vm407_vm5, %v429_v44 }
 0x642   :  { %2559 = vmatpush3.xpose.msk.msra.mxu1 %vm253_vm4, %v587_v24  ;;  %2560 = vmatprep.mubr.msk.f32.mxu1 %vm2863_vm3, %v2862_v51 }
 0x643   :  { %2568 = vmatprep.subr.mxu1 %v2862_v51 }
 0x645   :  { %2561 = vmatmul.mubr.msk.f32.vlgmr.msra.gmra.mrb[10].mxu1 %vm253_vm4, %v585_v40 }
 0x646   :  { %2570 = vmatprep.mubr.msk.f32.mxu1 %vm2863_vm3, %v2862_v51 }
 0x6df   :  { %v502_v45 = vpop.f32.mrb[6].mxu1 }
 0x6e0   :  { %582 = vst.msk [vmem:[#allocation2] sm:$0xff] %vm253_vm4, %v502_v45  ;;  %v2552_v46 = vpop.f32.mrb[7].mxu1  ;;  %v2734_v45 = vld [vmem:[%s3268_s2 + $0x28] sm:$0xff]  }
 0x70b   :  { %v736_v47 = vpop.f32.mrb[4].mxu0 }
 0x70c   :  { %v741_v48 = vmul.f32 0.25, %v736_v47  ;;  %v2567_v49 = vpop.f32.mrb[5].mxu0 }
 0x70e   :  { %v745_v50 = vsel %vm407_vm5, %v741_v48, -inf }
 0x70f   :  { %746 = vmax.xlane.f32.xlu0 %v745_v50 }
 0x714   :  { %v578_v52 = vpop.f32.mrb[8].mxu1 }
 0x715   :  { %583 = vst.msk [vmem:[#allocation2 + $0x8] sm:$0xff] %vm253_vm4, %v578_v52  ;;  %v2557_v53 = vpop.f32.mrb[9].mxu1 }
 0x718   :  { %v658_v54 = vpop.f32.mrb[10].mxu1 }
 0x719   :  { %v740_v55 = vmul.f32 0.25, %v658_v54  ;;  %v2562_v56 = vpop.f32.mrb[11].mxu1  ;;  %v2349_v54 = vld [vmem:[#allocation3 + $0x14] ss:$0 sm:$0xff] }
 0x71b   :  { %v742_v57 = vsel %vm407_vm5, %v740_v55, -inf }
 0x71c   :  { %743 = vmax.xlane.f32.xlu1 %v742_v57 }
 0x79c   :  { %v747_v58 = vpop.xlane.xlu0 %746 }
 0x79d   :  { %v749_v59 = vsub.f32 %v741_v48, %v747_v58 }
 0x79f   :  { %v752_v60 = vmul.f32 1.442695, %v749_v59  ;;  %v2350_v59 = vld [vmem:[#allocation3 + $0x15] ss:$0 sm:$0xff] }
 0x7a1   :  { %2761 = vpow2.f32 %v752_v60 }
 0x7a9   :  { %v744_v61 = vpop.xlane.xlu1 %743 }
 0x7aa   :  { %v748_v62 = vsub.f32 %v740_v55, %v744_v61 }
 0x7ab   :  { %v2762_v63 = vpop.eup %2761 }
 0x7ac   :  { %v750_v0 = vmul.f32 1.442695, %v748_v62  ;;  %v757_v1 = vsel %vm407_vm5, %v2762_v63, 0.0 }
 0x7ad   :  { %758 = vadd.xlane.f32.xlu1 %v757_v1  ;;  %v2736_v1 = vld [vmem:[%s3268_s2 + $0x38] sm:$0xff]  }
 0x7ae   :  { %2763 = vpow2.f32 %v750_v0  ;;  %v2735_v0 = vld [vmem:[%s3268_s2 + $0x30] sm:$0xff]  }
 0x7b8   :  { %v2764_v2 = vpop.eup %2763 }
 0x7b9   :  { %v754_v5 = vsel %vm407_vm5, %v2764_v2, 0.0 }
 0x7ba   :  { %755 = vadd.xlane.f32.xlu0 %v754_v5  ;;  %v2738_v5 = vld [vmem:[%s3268_s2 + $0x48] sm:$0xff]  }
 0x7be   :  { %840 = vrot.lane.b32.xlu1 %v2995_v12, %s2868_s17 }
 0x7d0   :  { %764 = vrot.lane.b32.xlu0 %v2989_v8, %s2868_s17 }
 0x83a   :  { %v759_v6 = vpop.xlane.xlu1 %758 }
 0x83b   :  { %2765 = vrcp.f32 %v759_v6  ;;  %v2351_v6 = vld [vmem:[#allocation3 + $0x16] ss:$0 sm:$0xff] }
 0x83e   :  { %v841_v7 = vpop.permute.xlu1 %840 }
 0x83f   :  { %2574 = vmatpush3.msra.mxu0 %v841_v7 }
 0x840   :  { %2586 = vmatprep.subr.bf16.mxu0 %v2862_v51 }
 0x845   :  { %v2766_v9 = vpop.eup %2765 }
 0x846   :  { %v763_v10 = vmul.f32 %v2766_v9, %v2762_v63 }
 0x847   :  { %v756_v11 = vpop.xlane.xlu0 %755 }
 0x848   :  { %2767 = vrcp.f32 %v756_v11  ;;  %2576 = vmatmul.mubr.msk.f32.vlgmr.msra.gmra.mrb[6].mxu0 %vm407_vm5, %v763_v10 }
 0x849   :  { %2590 = vmatprep.mubr.msk.bf16.mxu0 %vm2863_vm3, %v2862_v51 }
 0x84b   :  { %v765_v13 = vpop.permute.xlu0 %764 }
 0x84c   :  { %2569 = vmatpush3.msra.mxu1 %v765_v13 }
 0x84d   :  { %2578 = vmatprep.subr.bf16.mxu1 %v2862_v51 }
 0x852   :  { %v2768_v8 = vpop.eup %2767 }
 0x853   :  { %v761_v12 = vmul.f32 %v2768_v8, %v2764_v2  ;;  %v2737_v2 = vld [vmem:[%s3268_s2 + $0x40] sm:$0xff]  }
 0x855   :  { %2571 = vmatmul.mubr.msk.f32.vlgmr.msra.gmra.mrb[12].mxu1 %vm407_vm5, %v761_v12 }
 0x856   :  { %2582 = vmatprep.mubr.msk.bf16.mxu1 %vm2863_vm3, %v2862_v51  ;;  %2579 = vmatpush3.bf16.msra.mxu1 %v2731_v16 }
 0x857   :  { %2580 = vmatprep.subr.bf16.mxu1 %v2862_v51 }
 0x85a   :  { %2581 = vmatpush3.bf16.msra.mxu1 %v2732_v17 }
 0x85b   :  { %2594 = vmatprep.subr.bf16.mxu1 %v2862_v51 }
 0x91b   :  { %v912_v14 = vpop.f32.mrb[6].mxu0 }
 0x91c   :  { %920 = vrot.lane.b32.xlu0 %v912_v14, %s2869_s18  ;;  %v2577_v15 = vpop.f32.mrb[7].mxu0 }
 0x928   :  { %v836_v18 = vpop.f32.mrb[12].mxu1 }
 0x929   :  { %918 = vrot.lane.b32.xlu1 %v836_v18, %s2869_s18  ;;  %v2572_v19 = vpop.f32.mrb[13].mxu1 }
 0x98e   :  { %v921_v20 = vpop.permute.xlu0 %920 }
 0x98f   :  { %926 = vst.msk [vmem:[#allocation2 + $0x8] sm:$0xff] %vm924_vm6, %v921_v20 }
 0x996   :  { %v928_v23 = vld [vmem:[#allocation2 + $0x8] sm:$0xff] }
 0x99b   :  { %v919_v21 = vpop.permute.xlu1 %918 }
 0x99c   :  { %925 = vst.msk [vmem:[#allocation2] sm:$0xff] %vm924_vm6, %v919_v21 }
 0x9a3   :  { %v927_v22 = vld [vmem:[#allocation2] sm:$0xff] }
 0x9a4   :  { %v929_v24 = vpack.c.bf16 %v928_v23, %v927_v22 }
 0x9a6   :  { %2583 = vmatmul.mubr.msk.bf16.vlgmr.msra.gmra.mrb[16].mxu1 %vm144_vm2, %v929_v24 }
 0x9a7   :  { %2602 = vmatprep.mubr.msk.bf16.mxu1 %vm2863_vm3, %v2862_v51  ;;  %2595 = vmatpush3.bf16.msra.mxu1 %v2735_v0 }
 0x9a8   :  { %2596 = vmatprep.subr.bf16.mxu1 %v2862_v51 }
 0x9ab   :  { %2597 = vmatpush3.bf16.msra.mxu1 %v2736_v1 }
 0x9ac   :  { %2598 = vmatprep.subr.bf16.mxu1 %v2862_v51 }
 0x9af   :  { %2599 = vmatpush3.bf16.msra.mxu1 %v2737_v2  ;;  %v2362_v2 = vld [vmem:[#allocation3 + $0x19] ss:$0 sm:$0xff] }
 0x9b0   :  { %2600 = vmatprep.subr.bf16.mxu1 %v2862_v51 }
 0x9b3   :  { %2601 = vmatpush3.bf16.msra.mxu1 %v2738_v5 }
 0x9b4   :  { %2624 = vmatprep.subr.mxu1 %v2862_v51 }
 0xa79   :  { %v988_v26 = vpop.f32.mrb[16].mxu1 }
 0xa7a   :  { %v989_v27 = vadd.f32 %v2345_v25, %v988_v26  ;;  %v2584_v28 = vpop.f32.mrb[17].mxu1 }
 0xa7b   :  { %v991_v29 = vpop.f32.mrb[18].mxu1 }
 0xa7c   :  { %v992_v30 = vadd.f32 %v2345_v25, %v991_v29  ;;  %v2585_v31 = vpop.f32.mrb[19].mxu1  ;;  %v995_v32 = vadd.f32 %v989_v27, %v2980_v3 }
 0xa7e   :  { %v999_v33 = vsel %vm144_vm2, %v995_v32, 0.0  ;;  %v996_v34 = vadd.f32 %v992_v30, %v2982_v4  ;;  %v2733_v4 = vld [vmem:[%s3268_s2 + $0x20] sm:$0xff]  }
 0xa7f   :  { %1000 = vadd.xlane.f32.xlu1 %v999_v33  ;;  %2587 = vmatpush3.bf16.msra.mxu0 %v2733_v4 }
 0xa80   :  { %v1002_v35 = vsel %vm144_vm2, %v996_v34, 0.0  ;;  %2588 = vmatprep.subr.bf16.mxu0 %v2862_v51 }
 0xa81   :  { %1003 = vadd.xlane.f32.xlu0 %v1002_v35 }
 0xa83   :  { %2589 = vmatpush3.bf16.msra.mxu0 %v2734_v45 }
 0xa84   :  { %2606 = vmatprep.subr.bf16.mxu0 %v2862_v51 }
 0xb0c   :  { %v1001_v36 = vpop.xlane.xlu1 %1000 }
 0xb0d   :  { %v1005_v37 = vmul.f32 0.03125, %v1001_v36 }
 0xb0e   :  { %v1004_v38 = vpop.xlane.xlu0 %1003 }
 0xb0f   :  { %v1007_v39 = vsub.f32 %v995_v32, %v1005_v37  ;;  %v1006_v40 = vmul.f32 0.03125, %v1004_v38  ;;  %v2355_v32 = vld [vmem:[#allocation3 + $0x17] ss:$0 sm:$0xff] }
 0xb11   :  { %v1008_v41 = vsub.f32 %v996_v34, %v1006_v40  ;;  %v1009_v42 = vmul.f32 %v1007_v39, %v1007_v39 }
 0xb13   :  { %v1011_v43 = vsel %vm144_vm2, %v1009_v42, 0.0  ;;  %v1010_v44 = vmul.f32 %v1008_v41, %v1008_v41 }
 0xb14   :  { %1012 = vadd.xlane.f32.xlu0 %v1011_v43 }
 0xb15   :  { %v1014_v3 = vsel %vm144_vm2, %v1010_v44, 0.0 }
 0xb16   :  { %1015 = vadd.xlane.f32.xlu1 %v1014_v3 }
 0xba1   :  { %v1013_v46 = vpop.xlane.xlu0 %1012 }
 0xba2   :  { %v1017_v47 = vmul.f32 0.03125, %v1013_v46 }
 0xba3   :  { %v1016_v48 = vpop.xlane.xlu1 %1015 }
 0xba4   :  { %v1019_v49 = vadd.f32 1e-12, %v1017_v47  ;;  %v1018_v50 = vmul.f32 0.03125, %v1016_v48 }
 0xba6   :  { %2769 = vrsqrt.f32 %v1019_v49  ;;  %v1020_v52 = vadd.f32 1e-12, %v1018_v50 }
 0xba8   :  { %2771 = vrsqrt.f32 %v1020_v52  ;;  %v2739_v52 = vld [vmem:[%s3268_s2 + $0x50] sm:$0xff]  }
 0xbb0   :  { %v2770_v53 = vpop.eup %2769 }
 0xbb1   :  { %v1023_v55 = vmul.f32 %v2770_v53, %v1007_v39  ;;  %v2740_v53 = vld [vmem:[%s3268_s2 + $0x58] sm:$0xff]  }
 0xbb2   :  { %v2772_v56 = vpop.eup %2771 }
 0xbb3   :  { %v1029_v57 = vmul.f32 %v2349_v54, %v1023_v55  ;;  %v1024_v58 = vmul.f32 %v2772_v56, %v1008_v41 }
 0xbb5   :  { %v1030_v60 = vmul.f32 %v2349_v54, %v1024_v58  ;;  %v1035_v61 = vadd.f32 %v2350_v59, %v1029_v57 }
 0xbb7   :  { %v1036_v62 = vadd.f32 %v2350_v59, %v1030_v60 }
 0xbb9   :  { %v1037_v63 = vpack.c.bf16 %v1036_v62, %v1035_v61 }
 0xbbb   :  { %2591 = vmatmul.mubr.msk.bf16.vlgmr.msra.gmra.mrb[8].mxu0 %vm144_vm2, %v1037_v63 }
 0xbbc   :  { %2610 = vmatprep.mubr.msk.bf16.mxu0 %vm2863_vm3, %v2862_v51  ;;  %2607 = vmatpush3.bf16.msra.mxu0 %v2739_v52 }
 0xbbd   :  { %2608 = vmatprep.subr.bf16.mxu0 %v2862_v51 }
 0xbc0   :  { %2609 = vmatpush3.bf16.msra.mxu0 %v2740_v53 }
 0xbc1   :  { %2614 = vmatprep.subr.mxu0 %v2862_v51 }
 0xc8e   :  { %v1096_v7 = vpop.f32.mrb[8].mxu0 }
 0xc8f   :  { %v1097_v9 = vadd.f32 %v2351_v6, %v1096_v7  ;;  %v2592_v10 = vpop.f32.mrb[9].mxu0 }
 0xc90   :  { %v1099_v11 = vpop.f32.mrb[10].mxu0  ;;  %v2367_v10 = vld [vmem:[#allocation3 + $0x1a] ss:$0 sm:$0xff] }
 0xc91   :  { %v1103_v13 = vmul.f32 %v1097_v9, %v1097_v9  ;;  %v1100_v8 = vadd.f32 %v2351_v6, %v1099_v11  ;;  %v2593_v12 = vpop.f32.mrb[11].mxu0 }
 0xc93   :  { %v1105_v14 = vmul.f32 %v1103_v13, %v1097_v9  ;;  %v1104_v15 = vmul.f32 %v1100_v8, %v1100_v8 }
 0xc95   :  { %v1107_v16 = vmul.f32 0.044715, %v1105_v14  ;;  %v1106_v17 = vmul.f32 %v1104_v15, %v1100_v8 }
 0xc97   :  { %v1109_v18 = vadd.f32 %v1107_v16, %v1097_v9  ;;  %v1108_v19 = vmul.f32 0.044715, %v1106_v17 }
 0xc99   :  { %v1111_v20 = vmul.f32 0.7978846, %v1109_v18  ;;  %v1110_v21 = vadd.f32 %v1108_v19, %v1100_v8 }
 0xc9b   :  { %2773 = vtanh.f32 %v1111_v20  ;;  %v1112_v22 = vmul.f32 0.7978846, %v1110_v21 }
 0xc9d   :  { %2775 = vtanh.f32 %v1112_v22 }
 0xca5   :  { %v2774_v23 = vpop.eup %2773 }
 0xca6   :  { %v1115_v24 = vadd.f32 1.0, %v2774_v23 }
 0xca7   :  { %v2776_v25 = vpop.eup %2775 }
 0xca8   :  { %v1117_v26 = vmul.f32 0.5, %v1115_v24  ;;  %v1116_v27 = vadd.f32 1.0, %v2776_v25 }
 0xcaa   :  { %v1118_v28 = vmul.f32 0.5, %v1116_v27  ;;  %v1119_v29 = vmul.f32 %v1117_v26, %v1097_v9 }
 0xcac   :  { %v1120_v30 = vmul.f32 %v1118_v28, %v1100_v8 }
 0xcae   :  { %v1121_v31 = vpack.c.bf16 %v1120_v30, %v1119_v29 }
 0xcb0   :  { %2603 = vmatmul.mubr.msk.bf16.vlgmr.msra.gmra.mrb[20].mxu1 %vm1159_vm7, %v1121_v31 }
 0xcb1   :  { %2626 = vmatprep.mubr.msk.f32.mxu1 %vm2863_vm3, %v2862_v51 }
 0xd83   :  { %v1197_v33 = vpop.f32.mrb[20].mxu1 }
 0xd84   :  { %v1198_v34 = vadd.f32 %v2355_v32, %v1197_v33  ;;  %v2604_v35 = vpop.f32.mrb[21].mxu1 }
 0xd85   :  { %v1200_v36 = vpop.f32.mrb[22].mxu1 }
 0xd86   :  { %v1201_v37 = vadd.f32 %v2355_v32, %v1200_v36  ;;  %v2605_v38 = vpop.f32.mrb[23].mxu1  ;;  %v1204_v39 = vadd.f32 %v1198_v34, %v1035_v61  ;;  %v2361_v61 = vld [vmem:[#allocation3 + $0x18] ss:$0 sm:$0xff] }
 0xd88   :  { %v1208_v40 = vsel %vm144_vm2, %v1204_v39, 0.0  ;;  %v1205_v41 = vadd.f32 %v1201_v37, %v1036_v62 }
 0xd89   :  { %1209 = vadd.xlane.f32.xlu0 %v1208_v40 }
 0xd8a   :  { %v1211_v42 = vsel %vm144_vm2, %v1205_v41, 0.0 }
 0xd8b   :  { %1212 = vadd.xlane.f32.xlu1 %v1211_v42 }
 0xe16   :  { %v1210_v43 = vpop.xlane.xlu0 %1209 }
 0xe17   :  { %v1214_v44 = vmul.f32 0.03125, %v1210_v43 }
 0xe18   :  { %v1213_v3 = vpop.xlane.xlu1 %1212 }
 0xe19   :  { %v1216_v4 = vsub.f32 %v1204_v39, %v1214_v44  ;;  %v1215_v45 = vmul.f32 0.03125, %v1213_v3 }
 0xe1b   :  { %v1217_v46 = vsub.f32 %v1205_v41, %v1215_v45  ;;  %v1218_v47 = vmul.f32 %v1216_v4, %v1216_v4 }
 0xe1d   :  { %v1220_v48 = vsel %vm144_vm2, %v1218_v47, 0.0  ;;  %v1219_v49 = vmul.f32 %v1217_v46, %v1217_v46 }
 0xe1e   :  { %1221 = vadd.xlane.f32.xlu0 %v1220_v48 }
 0xe1f   :  { %v1223_v50 = vsel %vm144_vm2, %v1219_v49, 0.0 }
 0xe20   :  { %1224 = vadd.xlane.f32.xlu1 %v1223_v50 }
 0xeab   :  { %v1222_v54 = vpop.xlane.xlu0 %1221 }
 0xeac   :  { %v1226_v55 = vmul.f32 0.03125, %v1222_v54 }
 0xead   :  { %v1225_v56 = vpop.xlane.xlu1 %1224 }
 0xeae   :  { %v1228_v57 = vadd.f32 1e-12, %v1226_v55  ;;  %v1227_v58 = vmul.f32 0.03125, %v1225_v56 }
 0xeb0   :  { %2777 = vrsqrt.f32 %v1228_v57  ;;  %v1229_v59 = vadd.f32 1e-12, %v1227_v58 }
 0xeb2   :  { %2779 = vrsqrt.f32 %v1229_v59 }
 0xeba   :  { %v2778_v60 = vpop.eup %2777 }
 0xebb   :  { %v1232_v62 = vmul.f32 %v2778_v60, %v1216_v4 }
 0xebc   :  { %v2780_v63 = vpop.eup %2779 }
 0xebd   :  { %v1238_v0 = vmul.f32 %v2361_v61, %v1232_v62  ;;  %v1233_v1 = vmul.f32 %v2780_v63, %v1217_v46 }
 0xebf   :  { %v1239_v5 = vmul.f32 %v2361_v61, %v1233_v1  ;;  %v3124_v6 = vadd.f32 %v2362_v2, %v1238_v0 }
 0xec1   :  { %v3126_v7 = vadd.f32 %v2362_v2, %v1239_v5 }
 0xec3   :  { %v1246_v9 = vpack.c.bf16 %v3126_v7, %v3124_v6 }
 0xec5   :  { %2611 = vmatmul.mubr.msk.bf16.vlgmr.msra.gmra.mrb[12].mxu0 %vm144_vm2, %v1246_v9 }
 0xec6   :  { %2616 = vmatprep.mubr.msk.f32.mxu0 %vm2863_vm3, %v2862_v51 }
 0xf98   :  { %v1306_v11 = vpop.f32.mrb[12].mxu0 }
 0xf99   :  { %v3133_v13 = vadd.f32 %v2367_v10, %v1306_v11  ;;  %v2612_v8 = vpop.f32.mrb[13].mxu0 }
 0xf9a   :  { %v1309_v12 = vpop.f32.mrb[14].mxu0 }
 0xf9b   :  { %v3135_v14 = vadd.f32 %v2367_v10, %v1309_v12  ;;  %1314 = vrot.lane.b32.xlu0 %v3133_v13, %s2865_s14  ;;  %v2613_v15 = vpop.f32.mrb[15].mxu0 }
 0xf9d   :  { %1391 = vrot.lane.b32.xlu1 %v3135_v14, %s2865_s14 }
0x100d   :  { %v1315_v16 = vpop.permute.xlu0 %1314 }
0x100e   :  { %2615 = vmatpush3.xpose.msk.msra.mxu0 %vm253_vm4, %v1315_v16 }
0x100f   :  { %2619 = vmatprep.subr.mxu0 %v2862_v51  ;;  %v1392_v17 = vpop.permute.xlu1 %1391 }
0x1011   :  { %2617 = vmatmul.mubr.msk.f32.vlgmr.msra.gmra.mrb[16].mxu0 %vm253_vm4, %v3133_v13 }
0x1012   :  { %2620 = vmatpush3.xpose.msk.msra.mxu0 %vm253_vm4, %v1392_v17  ;;  %2621 = vmatprep.mubr.msk.f32.mxu0 %vm2863_vm3, %v2862_v51  ;;  %v2741_v17 = vld [vmem:[%s3268_s2 + $0x60] sm:$0xff]  }
0x1013   :  { %2629 = vmatprep.subr.mxu0 %v2862_v51 }
0x1015   :  { %2622 = vmatmul.mubr.msk.f32.vlgmr.msra.gmra.mrb[18].mxu0 %vm253_vm4, %v3135_v14 }
0x1016   :  { %2631 = vmatprep.mubr.msk.f32.mxu0 %vm2863_vm3, %v2862_v51 }
0x10e4   :  { %v1386_v18 = vpop.f32.mrb[16].mxu0 }
0x10e5   :  { %v1467_v19 = vmul.f32 0.25, %v1386_v18  ;;  %v2618_v20 = vpop.f32.mrb[17].mxu0  ;;  %v2742_v18 = vld [vmem:[%s3268_s2 + $0x68] sm:$0xff]  }
0x10e7   :  { %v1469_v21 = vsel %vm407_vm5, %v1467_v19, -inf }
0x10e8   :  { %1470 = vmax.xlane.f32.xlu1 %v1469_v21  ;;  %v1463_v22 = vpop.f32.mrb[18].mxu0 }
0x10e9   :  { %v1468_v23 = vmul.f32 0.25, %v1463_v22  ;;  %v2623_v24 = vpop.f32.mrb[19].mxu0 }
0x10eb   :  { %v1472_v25 = vsel %vm407_vm5, %v1468_v23, -inf }
0x10ec   :  { %1473 = vmax.xlane.f32.xlu0 %v1472_v25 }
0x10f9   :  { %1567 = vrot.lane.b32.xlu1 %v3135_v14, %s2864_s13 }
0x10fd   :  { %1647 = vrot.lane.b32.xlu1 %v3133_v13, %s2866_s15 }
0x1102   :  { %1491 = vrot.lane.b32.xlu0 %v3133_v13, %s2864_s13 }
0x1106   :  { %1725 = vrot.lane.b32.xlu0 %v3135_v14, %s2866_s15 }
0x1175   :  { %v1471_v26 = vpop.xlane.xlu1 %1470 }
0x1176   :  { %v1475_v27 = vsub.f32 %v1467_v19, %v1471_v26 }
0x1178   :  { %v1477_v28 = vmul.f32 1.442695, %v1475_v27 }
0x1179   :  { %v1568_v29 = vpop.permute.xlu1 %1567  ;;  %v1474_v30 = vpop.xlane.xlu0 %1473 }
0x117a   :  { %2781 = vpow2.f32 %v1477_v28  ;;  %v1476_v31 = vsub.f32 %v1468_v23, %v1474_v30  ;;  %2630 = vmatpush3.msra.mxu0 %v1568_v29  ;;  %v2387_v28 = vld [vmem:[#allocation3 + $0x1b] ss:$0 sm:$0xff] }
0x117b   :  { %2639 = vmatprep.subr.mxu0 %v2862_v51 }
0x117c   :  { %v1479_v32 = vmul.f32 1.442695, %v1476_v31 }
0x117d   :  { %v1492_v33 = vpop.permute.xlu0 %1491  ;;  %v1648_v39 = vpop.permute.xlu1 %1647 }
0x117e   :  { %2783 = vpow2.f32 %v1479_v32  ;;  %2625 = vmatpush3.msra.mxu1 %v1492_v33 }
0x117f   :  { %2634 = vmatprep.subr.mxu1 %v2862_v51 }
0x1181   :  { %v1726_v38 = vpop.permute.xlu0 %1725 }
0x1184   :  { %v2782_v34 = vpop.eup %2781 }
0x1185   :  { %v1481_v35 = vsel %vm407_vm5, %v2782_v34, 0.0 }
0x1186   :  { %1482 = vadd.xlane.f32.xlu0 %v1481_v35 }
0x1188   :  { %v2784_v36 = vpop.eup %2783 }
0x1189   :  { %v1484_v37 = vsel %vm407_vm5, %v2784_v36, 0.0 }
0x118a   :  { %1485 = vadd.xlane.f32.xlu1 %v1484_v37 }
0x119b   :  { %1645 = vrot.lane.b32.xlu1 %v3133_v13, %s2867_s16 }
0x119c   :  { %1723 = vrot.lane.b32.xlu0 %v3135_v14, %s2867_s16 }
0x1213   :  { %v1483_v40 = vpop.xlane.xlu0 %1482 }
0x1214   :  { %2785 = vrcp.f32 %v1483_v40 }
0x1217   :  { %v1486_v41 = vpop.xlane.xlu1 %1485  ;;  %v1724_v45 = vpop.permute.xlu0 %1723 }
0x1218   :  { %2787 = vrcp.f32 %v1486_v41 }
0x121b   :  { %v1646_v4 = vpop.permute.xlu1 %1645 }
0x121e   :  { %v2786_v42 = vpop.eup %2785 }
0x121f   :  { %v1488_v43 = vmul.f32 %v2786_v42, %v2782_v34 }
0x1221   :  { %2627 = vmatmul.mubr.msk.f32.vlgmr.msra.gmra.mrb[14].mxu1 %vm407_vm5, %v1488_v43 }
0x1222   :  { %v2788_v44 = vpop.eup %2787  ;;  %2635 = vmatpush3.xpose.msk.msra.mxu1 %vm253_vm4, %v1648_v39  ;;  %2636 = vmatprep.mubr.msk.f32.mxu1 %vm2863_vm3, %v2862_v51 }
0x1223   :  { %v1490_v3 = vmul.f32 %v2788_v44, %v2784_v36  ;;  %2644 = vmatprep.subr.mxu1 %v2862_v51 }
0x1225   :  { %2632 = vmatmul.mubr.msk.f32.vlgmr.msra.gmra.mrb[20].mxu0 %vm407_vm5, %v1490_v3  ;;  %2637 = vmatmul.mubr.msk.f32.vlgmr.msra.gmra.mrb[24].mxu1 %vm253_vm4, %v1646_v4 }
0x1226   :  { %2640 = vmatpush3.xpose.msk.msra.mxu0 %vm253_vm4, %v1726_v38  ;;  %2641 = vmatprep.mubr.msk.f32.mxu0 %vm2863_vm3, %v2862_v51 }
0x1227   :  { %2649 = vmatprep.subr.mxu0 %v2862_v51  ;;  %2646 = vmatprep.mubr.msk.f32.mxu1 %vm2863_vm3, %v2862_v51 }
0x1229   :  { %2642 = vmatmul.mubr.msk.f32.vlgmr.msra.gmra.mrb[22].mxu0 %vm253_vm4, %v1724_v45 }
0x122a   :  { %2651 = vmatprep.mubr.msk.f32.mxu0 %vm2863_vm3, %v2862_v51 }
0x12f4   :  { %v1563_v46 = vpop.f32.mrb[14].mxu1 }
0x12f5   :  { %1643 = vst.msk [vmem:[#allocation2] sm:$0xff] %vm253_vm4, %v1563_v46  ;;  %v2628_v47 = vpop.f32.mrb[15].mxu1  ;;  %v2744_v46 = vld [vmem:[%s3268_s2 + $0x78] sm:$0xff]  }
0x12f8   :  { %v1639_v48 = vpop.f32.mrb[20].mxu0  ;;  %v1719_v49 = vpop.f32.mrb[24].mxu1 }
0x12f9   :  { %1644 = vst.msk [vmem:[#allocation2 + $0x8] sm:$0xff] %vm253_vm4, %v1639_v48  ;;  %v1801_v50 = vmul.f32 0.25, %v1719_v49  ;;  %v2633_v52 = vpop.f32.mrb[21].mxu0  ;;  %v2638_v53 = vpop.f32.mrb[25].mxu1 }
0x12fb   :  { %v1803_v54 = vsel %vm407_vm5, %v1801_v50, -inf }
0x12fc   :  { %v1797_v55 = vpop.f32.mrb[22].mxu0  ;;  %1804 = vmax.xlane.f32.xlu1 %v1803_v54 }
0x12fd   :  { %v1802_v56 = vmul.f32 0.25, %v1797_v55  ;;  %v2643_v57 = vpop.f32.mrb[23].mxu0  ;;  %v2391_v55 = vld [vmem:[#allocation3 + $0x1c] ss:$0 sm:$0xff] }
0x12ff   :  { %v1806_v58 = vsel %vm407_vm5, %v1802_v56, -inf }
0x1300   :  { %1807 = vmax.xlane.f32.xlu0 %v1806_v58 }
0x1389   :  { %v1805_v59 = vpop.xlane.xlu1 %1804 }
0x138a   :  { %v1809_v60 = vsub.f32 %v1801_v50, %v1805_v59 }
0x138c   :  { %v1811_v61 = vmul.f32 1.442695, %v1809_v60  ;;  %v2392_v60 = vld [vmem:[#allocation3 + $0x1d] ss:$0 sm:$0xff] }
0x138d   :  { %v1808_v62 = vpop.xlane.xlu0 %1807 }
0x138e   :  { %2789 = vpow2.f32 %v1811_v61  ;;  %v1810_v63 = vsub.f32 %v1802_v56, %v1808_v62 }
0x1390   :  { %v1813_v0 = vmul.f32 1.442695, %v1810_v63 }
0x1392   :  { %2791 = vpow2.f32 %v1813_v0 }
0x1398   :  { %v2790_v1 = vpop.eup %2789 }
0x1399   :  { %v1815_v2 = vsel %vm407_vm5, %v2790_v1, 0.0 }
0x139a   :  { %1816 = vadd.xlane.f32.xlu0 %v1815_v2  ;;  %v2746_v2 = vld [vmem:[%s3268_s2 + $0x88] sm:$0xff]  }
0x139c   :  { %v2792_v5 = vpop.eup %2791 }
0x139d   :  { %v1818_v9 = vsel %vm407_vm5, %v2792_v5, 0.0 }
0x139e   :  { %1819 = vadd.xlane.f32.xlu1 %v1818_v9  ;;  %v2748_v9 = vld [vmem:[%s3268_s2 + $0x98] sm:$0xff]  }
0x13af   :  { %1901 = vrot.lane.b32.xlu1 %v3135_v14, %s2868_s17 }
0x13b0   :  { %1825 = vrot.lane.b32.xlu0 %v3133_v13, %s2868_s17 }
0x1427   :  { %v1817_v10 = vpop.xlane.xlu0 %1816 }
0x1428   :  { %2793 = vrcp.f32 %v1817_v10  ;;  %v2397_v10 = vld [vmem:[#allocation3 + $0x1e] ss:$0 sm:$0xff] }
0x142b   :  { %v1826_v11 = vpop.permute.xlu0 %1825  ;;  %v1820_v8 = vpop.xlane.xlu1 %1819 }
0x142c   :  { %2795 = vrcp.f32 %v1820_v8  ;;  %2645 = vmatpush3.msra.mxu1 %v1826_v11 }
0x142d   :  { %2654 = vmatprep.subr.bf16.mxu1 %v2862_v51 }
0x142f   :  { %v1902_v12 = vpop.permute.xlu1 %1901 }
0x1430   :  { %2650 = vmatpush3.msra.mxu0 %v1902_v12 }
0x1431   :  { %2662 = vmatprep.subr.bf16.mxu0 %v2862_v51 }
0x1432   :  { %v2794_v15 = vpop.eup %2793 }
0x1433   :  { %v1822_v16 = vmul.f32 %v2794_v15, %v2790_v1  ;;  %v2745_v1 = vld [vmem:[%s3268_s2 + $0x80] sm:$0xff]  }
0x1435   :  { %2647 = vmatmul.mubr.msk.f32.vlgmr.msra.gmra.mrb[26].mxu1 %vm407_vm5, %v1822_v16 }
0x1436   :  { %v2796_v14 = vpop.eup %2795  ;;  %2658 = vmatprep.mubr.msk.bf16.mxu1 %vm2863_vm3, %v2862_v51  ;;  %2655 = vmatpush3.bf16.msra.mxu1 %v2741_v17 }
0x1437   :  { %v1824_v13 = vmul.f32 %v2796_v14, %v2792_v5  ;;  %2656 = vmatprep.subr.bf16.mxu1 %v2862_v51  ;;  %v2747_v5 = vld [vmem:[%s3268_s2 + $0x90] sm:$0xff]  }
0x1439   :  { %2652 = vmatmul.mubr.msk.f32.vlgmr.msra.gmra.mrb[24].mxu0 %vm407_vm5, %v1824_v13 }
0x143a   :  { %2666 = vmatprep.mubr.msk.bf16.mxu0 %vm2863_vm3, %v2862_v51  ;;  %2657 = vmatpush3.bf16.msra.mxu1 %v2742_v18 }
0x143b   :  { %2670 = vmatprep.subr.bf16.mxu1 %v2862_v51 }
0x1508   :  { %v1897_v19 = vpop.f32.mrb[26].mxu1 }
0x1509   :  { %1979 = vrot.lane.b32.xlu1 %v1897_v19, %s2869_s18  ;;  %v2648_v20 = vpop.f32.mrb[27].mxu1 }
0x150c   :  { %v1973_v21 = vpop.f32.mrb[24].mxu0 }
0x150d   :  { %1981 = vrot.lane.b32.xlu0 %v1973_v21, %s2869_s18  ;;  %v2653_v22 = vpop.f32.mrb[25].mxu0 }
0x157b   :  { %v1980_v23 = vpop.permute.xlu1 %1979 }
0x157c   :  { %1985 = vst.msk [vmem:[#allocation2] sm:$0xff] %vm924_vm6, %v1980_v23 }
0x157f   :  { %v1982_v24 = vpop.permute.xlu0 %1981 }
0x1580   :  { %1986 = vst.msk [vmem:[#allocation2 + $0x8] sm:$0xff] %vm924_vm6, %v1982_v24 }
0x1583   :  { %v1987_v25 = vld [vmem:[#allocation2] sm:$0xff] }
0x1587   :  { %v1988_v26 = vld [vmem:[#allocation2 + $0x8] sm:$0xff] }
0x1588   :  { %v1989_v27 = vpack.c.bf16 %v1988_v26, %v1987_v25 }
0x158a   :  { %2659 = vmatmul.mubr.msk.bf16.vlgmr.msra.gmra.mrb[28].mxu1 %vm144_vm2, %v1989_v27 }
0x158b   :  { %2678 = vmatprep.mubr.msk.bf16.mxu1 %vm2863_vm3, %v2862_v51  ;;  %2671 = vmatpush3.bf16.msra.mxu1 %v2745_v1 }
0x158c   :  { %2672 = vmatprep.subr.bf16.mxu1 %v2862_v51 }
0x158f   :  { %2673 = vmatpush3.bf16.msra.mxu1 %v2746_v2 }
0x1590   :  { %2674 = vmatprep.subr.bf16.mxu1 %v2862_v51 }
0x1593   :  { %2675 = vmatpush3.bf16.msra.mxu1 %v2747_v5 }
0x1594   :  { %2676 = vmatprep.subr.bf16.mxu1 %v2862_v51 }
0x1597   :  { %2677 = vmatpush3.bf16.msra.mxu1 %v2748_v9 }
0x165d   :  { %v2048_v29 = vpop.f32.mrb[28].mxu1 }
0x165e   :  { %v2049_v30 = vadd.f32 %v2387_v28, %v2048_v29  ;;  %v2660_v31 = vpop.f32.mrb[29].mxu1 }
0x165f   :  { %v2051_v32 = vpop.f32.mrb[30].mxu1 }
0x1660   :  { %v2052_v33 = vadd.f32 %v2387_v28, %v2051_v32  ;;  %v2661_v34 = vpop.f32.mrb[31].mxu1  ;;  %v2055_v35 = vadd.f32 %v2049_v30, %v3124_v6 }
0x1661   :  { %v2409_v34 = vld [vmem:[#allocation3 + $0x1f] ss:$0 sm:$0xff] }
0x1662   :  { %v2059_v36 = vsel %vm144_vm2, %v2055_v35, 0.0  ;;  %v2056_v37 = vadd.f32 %v2052_v33, %v3126_v7  ;;  %v2743_v7 = vld [vmem:[%s3268_s2 + $0x70] sm:$0xff]   ;;  %s2870_s2 = smov [#allocation6]  }
0x1663   :  { %2060 = vadd.xlane.f32.xlu1 %v2059_v36  ;;  %2663 = vmatpush3.bf16.msra.mxu0 %v2743_v7  ;;  %s2314_s25 = sshll.u32 %s2870_s2, 4  ;;  %s2315_s25 = int_to_ptr.vmem [resolvable:$true] %s2314_s25 }
0x1664   :  { %v2062_v38 = vsel %vm144_vm2, %v2056_v37, 0.0  ;;  %2664 = vmatprep.subr.bf16.mxu0 %v2862_v51  ;;  %s2831_s26 = scalar_lea.vmem %s2315_s25, 32  ;;  %p2836_p9 = scmp.lt.s32.totalorder %s2315_s25, %s2315_s25 }
0x1665   :  { %2063 = vadd.xlane.f32.xlu0 %v2062_v38  ;;  %p2832_p8 = scmp.ne.s32.totalorder %s2315_s25, %s2831_s26  ;;  %p2837_p10 = scmp.lt.s32.totalorder %s2831_s26, %s2831_s26 }
0x1667   :  { %2665 = vmatpush3.bf16.msra.mxu0 %v2744_v46  ;;  %p2838_p11 = por %p2837_p10, %p2836_p9 }
0x1669   :  { %p2839_p12 = pnand %p2838_p11, %p2832_p8 }
0x16f0   :  { %v2061_v39 = vpop.xlane.xlu1 %2060 }
0x16f1   :  { %v2065_v40 = vmul.f32 0.03125, %v2061_v39 }
0x16f2   :  { %v2064_v41 = vpop.xlane.xlu0 %2063 }
0x16f3   :  { %v2067_v42 = vsub.f32 %v2055_v35, %v2065_v40  ;;  %v2066_v43 = vmul.f32 0.03125, %v2064_v41 }
0x16f5   :  { %v2068_v44 = vsub.f32 %v2056_v37, %v2066_v43  ;;  %v2069_v3 = vmul.f32 %v2067_v42, %v2067_v42 }
0x16f7   :  { %v2071_v4 = vsel %vm144_vm2, %v2069_v3, 0.0  ;;  %v2070_v45 = vmul.f32 %v2068_v44, %v2068_v44 }
0x16f8   :  { %2072 = vadd.xlane.f32.xlu0 %v2071_v4 }
0x16f9   :  { %v2074_v6 = vsel %vm144_vm2, %v2070_v45, 0.0 }
0x16fa   :  { %2075 = vadd.xlane.f32.xlu1 %v2074_v6 }
0x1785   :  { %v2073_v47 = vpop.xlane.xlu0 %2072 }
0x1786   :  { %v2077_v48 = vmul.f32 0.03125, %v2073_v47 }
0x1787   :  { %v2076_v49 = vpop.xlane.xlu1 %2075 }
0x1788   :  { %v2079_v50 = vadd.f32 1e-12, %v2077_v48  ;;  %v2078_v52 = vmul.f32 0.03125, %v2076_v49 }
0x178a   :  { %2797 = vrsqrt.f32 %v2079_v50  ;;  %v2080_v53 = vadd.f32 1e-12, %v2078_v52 }
0x178c   :  { %2799 = vrsqrt.f32 %v2080_v53 }
0x1794   :  { %v2798_v54 = vpop.eup %2797 }
0x1795   :  { %v2083_v56 = vmul.f32 %v2798_v54, %v2067_v42 }
0x1796   :  { %v2800_v57 = vpop.eup %2799 }
0x1797   :  { %v2089_v58 = vmul.f32 %v2391_v55, %v2083_v56  ;;  %v2084_v59 = vmul.f32 %v2800_v57, %v2068_v44 }
0x1799   :  { %v2090_v61 = vmul.f32 %v2391_v55, %v2084_v59  ;;  %v2095_v62 = vadd.f32 %v2392_v60, %v2089_v58  ;;  %v2415_v59 = vld [vmem:[#allocation3 + $0x20] ss:$0 sm:$0xff] }
0x179b   :  { %v2096_v63 = vadd.f32 %v2392_v60, %v2090_v61 }
0x179d   :  { %v2097_v0 = vpack.c.bf16 %v2096_v63, %v2095_v62 }
0x179f   :  { %2667 = vmatmul.mubr.msk.bf16.vlgmr.msra.gmra.mrb[28].mxu0 %vm144_vm2, %v2097_v0 }
0x1872   :  { %v2156_v11 = vpop.f32.mrb[28].mxu0 }
0x1873   :  { %v2157_v8 = vadd.f32 %v2397_v10, %v2156_v11  ;;  %v2668_v12 = vpop.f32.mrb[29].mxu0 }
0x1874   :  { %v2159_v15 = vpop.f32.mrb[30].mxu0 }
0x1875   :  { %v2163_v16 = vmul.f32 %v2157_v8, %v2157_v8  ;;  %v2160_v14 = vadd.f32 %v2397_v10, %v2159_v15  ;;  %v2669_v13 = vpop.f32.mrb[31].mxu0 }
0x1877   :  { %v2165_v17 = vmul.f32 %v2163_v16, %v2157_v8  ;;  %v2164_v18 = vmul.f32 %v2160_v14, %v2160_v14 }
0x1879   :  { %v2167_v19 = vmul.f32 0.044715, %v2165_v17  ;;  %v2166_v20 = vmul.f32 %v2164_v18, %v2160_v14 }
0x187b   :  { %v2169_v21 = vadd.f32 %v2167_v19, %v2157_v8  ;;  %v2168_v22 = vmul.f32 0.044715, %v2166_v20 }
0x187d   :  { %v2171_v51 = vmul.f32 0.7978846, %v2169_v21  ;;  %v2170_v23 = vadd.f32 %v2168_v22, %v2160_v14 }
0x187f   :  { %2801 = vtanh.f32 %v2171_v51  ;;  %v2172_v24 = vmul.f32 0.7978846, %v2170_v23 }
0x1881   :  { %2803 = vtanh.f32 %v2172_v24 }
0x1889   :  { %v2802_v25 = vpop.eup %2801 }
0x188a   :  { %v2175_v26 = vadd.f32 1.0, %v2802_v25 }
0x188b   :  { %v2804_v27 = vpop.eup %2803 }
0x188c   :  { %v2177_v28 = vmul.f32 0.5, %v2175_v26  ;;  %v2176_v29 = vadd.f32 1.0, %v2804_v27 }
0x188e   :  { %v2178_v30 = vmul.f32 0.5, %v2176_v29  ;;  %v2179_v31 = vmul.f32 %v2177_v28, %v2157_v8 }
0x1890   :  { %v2180_v32 = vmul.f32 %v2178_v30, %v2160_v14 }
0x1892   :  { %v2181_v33 = vpack.c.bf16 %v2180_v32, %v2179_v31 }
0x1894   :  { %2679 = vmatmul.mubr.msk.bf16.vlgmr.msra.gmra.mrb[32].mxu1 %vm1159_vm7, %v2181_v33 }
0x1967   :  { %v2256_v35 = vpop.f32.mrb[32].mxu1 }
0x1968   :  { %v2257_v36 = vadd.f32 %v2409_v34, %v2256_v35  ;;  %v2680_v37 = vpop.f32.mrb[33].mxu1 }
0x1969   :  { %v2259_v38 = vpop.f32.mrb[34].mxu1 }
0x196a   :  { %v2260_v39 = vadd.f32 %v2409_v34, %v2259_v38  ;;  %v2681_v40 = vpop.f32.mrb[35].mxu1  ;;  %v2263_v41 = vadd.f32 %v2257_v36, %v2095_v62  ;;  %v2416_v62 = vld [vmem:[#allocation3 + $0x21] ss:$0 sm:$0xff] }
0x196c   :  { %v2267_v42 = vsel %vm144_vm2, %v2263_v41, 0.0  ;;  %v2264_v43 = vadd.f32 %v2260_v39, %v2096_v63 }
0x196d   :  { %2268 = vadd.xlane.f32.xlu0 %v2267_v42 }
0x196e   :  { %v2270_v44 = vsel %vm144_vm2, %v2264_v43, 0.0 }
0x196f   :  { %2271 = vadd.xlane.f32.xlu1 %v2270_v44 }
0x19fa   :  { %v2269_v3 = vpop.xlane.xlu0 %2268 }
0x19fb   :  { %v2273_v4 = vmul.f32 0.03125, %v2269_v3 }
0x19fc   :  { %v2272_v45 = vpop.xlane.xlu1 %2271 }
0x19fd   :  { %v2275_v6 = vsub.f32 %v2263_v41, %v2273_v4  ;;  %v2274_v7 = vmul.f32 0.03125, %v2272_v45 }
0x19ff   :  { %v2276_v46 = vsub.f32 %v2264_v43, %v2274_v7  ;;  %v2277_v47 = vmul.f32 %v2275_v6, %v2275_v6 }
0x1a01   :  { %v2279_v48 = vsel %vm144_vm2, %v2277_v47, 0.0  ;;  %v2278_v49 = vmul.f32 %v2276_v46, %v2276_v46 }
0x1a02   :  { %2280 = vadd.xlane.f32.xlu0 %v2279_v48 }
0x1a03   :  { %v2282_v50 = vsel %vm144_vm2, %v2278_v49, 0.0 }
0x1a04   :  { %2283 = vadd.xlane.f32.xlu1 %v2282_v50 }
0x1a8f   :  { %v2281_v52 = vpop.xlane.xlu0 %2280 }
0x1a90   :  { %v2285_v53 = vmul.f32 0.03125, %v2281_v52 }
0x1a91   :  { %v2284_v54 = vpop.xlane.xlu1 %2283 }
0x1a92   :  { %v2287_v55 = vadd.f32 1e-12, %v2285_v53  ;;  %v2286_v56 = vmul.f32 0.03125, %v2284_v54 }
0x1a94   :  { %2805 = vrsqrt.f32 %v2287_v55  ;;  %v2288_v57 = vadd.f32 1e-12, %v2286_v56 }
0x1a96   :  { %2807 = vrsqrt.f32 %v2288_v57 }
0x1a9e   :  { %v2806_v58 = vpop.eup %2805 }
0x1a9f   :  { %v2291_v60 = vmul.f32 %v2806_v58, %v2275_v6 }
0x1aa0   :  { %v2808_v61 = vpop.eup %2807 }
0x1aa1   :  { %v2292_v63 = vmul.f32 %v2808_v61, %v2276_v46  ;;  %v2297_v0 = vmul.f32 %v2415_v59, %v2291_v60 }
0x1aa3   :  { %v2298_v1 = vmul.f32 %v2415_v59, %v2292_v63  ;;  %v2303_v2 = vadd.f32 %v2416_v62, %v2297_v0 }
0x1aa5   :  { %v2304_v5 = vadd.f32 %v2416_v62, %v2298_v1  ;;  %2306 = vst.msk [vmem:[#allocation6] sm:$0x1] %vm2305_vm8, %v2303_v2 }
0x1aa7   :  { %2307 = vst.msk [vmem:[#allocation6 + $0x1] sm:$0x1] %vm2305_vm8, %v2304_v5 }
0x1aa8   :  { %2842 = shalt.err (!%p2839_p12)
}
0x1aa9   :  { %s2843_s29 = scalar_lea.hbm %s3270_s4, 32 }
0x1aaa   :  { %p2844_p13 = scmp.ne.s32.totalorder %s3270_s4, %s2843_s29  ;;  %p2847_p0 = scmp.lt.u32.totalorder %s2843_s29, %s3270_s4 }
0x1aac   :  { %p2849_p1 = pnand %p2847_p0, %p2844_p13 }
0x1aae   :  { %2852 = shalt.err (!%p2849_p1)
}
0x1aaf   :  { %2317 = dma.vmem_to_hbm [thread:$0]  %s2315_s25, 32, %s3270_s4, [#allocation5]  }
0x1ab0   :  { %2855 = dma.done.wait [#allocation5], 32  }
0x1ab1   :  { %2856 = vsyncadd [#allocation5], 4294967264 }
0x1ab2   :  { %2321 = vsyncpa [#allocation4], 1 }
0x1ab3   :  { %2322 = vsyncpa [#allocation5], 1 }

</bundles_post_ra>
